<compile_context>
chip_gen: v7x
topology: tpu7x:2x2x1
jax: 0.10.0
libtpu: 0.0.40
codegen_flags: <defaults>
</compile_context>

<pallas_src>
import functools

import jax
import jax.numpy as jnp
import numpy as np
from jax import lax
from jax.experimental import pallas as pl
from jax.experimental.pallas import tpu as pltpu


def next_fast_len(size: int) -> int:
    """Smallest n >= size whose prime factors are all in {2, 3, 5}."""
    if size <= 1:
        return 1
    n = size
    while True:
        k = n
        for p in (2, 3, 5):
            while k % p == 0:
                k //= p
        if k == 1:
            return n
        n += 1


def _round_up(x: int, m: int) -> int:
    return ((x + m - 1) // m) * m


def _pick_channel_tile(hd: int, max_tile: int = 512):
    """Return (channel_tile, padded_HD).  Large HD is tiled with a multiple of
    128 (never a tiny divisor, never the full HD); HD is padded instead."""
    if hd <= max_tile:
        return hd, hd
    best_t, best_pad = None, None
    for t in range(max_tile, 127, -128):            # multiples of 128 only
        padded = _round_up(hd, t)
        if best_pad is None or padded < best_pad:
            best_t, best_pad = t, padded
    return best_t, best_pad


def _split_bf16(v):
    """hi/lo bf16 split of an f32 array: v ~= hi + lo (bf16x3 matmul trick)."""
    hi = v.astype(jnp.bfloat16)
    lo = (v - hi.astype(jnp.float32)).astype(jnp.bfloat16)
    return hi, lo


def _dot3(a_hi, a_lo, b_hi, b_lo):
    """bf16x3 emulation of an f32 matmul (~ lax.Precision.HIGH), f32 accumulate."""
    out = jnp.dot(a_hi, b_hi, preferred_element_type=jnp.float32)
    out = out + jnp.dot(a_hi, b_lo, preferred_element_type=jnp.float32)
    if a_lo is not None:
        out = out + jnp.dot(a_lo, b_hi, preferred_element_type=jnp.float32)
    return out


def _dft_matrices(L: int, n: int, f_pad: int):
    """Fused real-DFT matrices, zero-padded along the frequency axis to f_pad."""
    F = n // 2 + 1
    f = jnp.arange(F, dtype=jnp.float32)
    t = jnp.arange(L, dtype=jnp.float32)
    ang = (2.0 * jnp.pi / n) * t[:, None] * f[None, :]            # (L, F)
    # forward rfft (norm='forward' -> 1/n); zero padding of x beyond L is free.
    fdft = jnp.zeros((L, 2 * f_pad), jnp.float32)
    fdft = fdft.at[:, :F].set(jnp.cos(ang) / n)
    fdft = fdft.at[:, f_pad:f_pad + F].set(-jnp.sin(ang) / n)
    # unscaled inverse rfft (norm='forward') with Hermitian doubling weights.
    w = jnp.full((F,), 2.0, jnp.float32).at[0].set(1.0)
    if n % 2 == 0:
        w = w.at[F - 1].set(1.0)
    idft = jnp.zeros((2 * f_pad, L), jnp.float32)
    idft = idft.at[:F, :].set(w[:, None] * jnp.cos(ang.T))
    idft = idft.at[f_pad:f_pad + F, :].set(-(w[:, None] * jnp.sin(ang.T)))
    return fdft, idft


def _fft_conv_kernel(x_ref, kri_ref, bias_ref, mask_ref,
                     fdh_ref, fdl_ref, idh_ref, idl_ref, o_ref):
    # x_ref:    (1, tc, L)   inputs for this (batch, channel-tile), native dtype
    # kri_ref:  (tc, 2*Fp)   [K_r | K_i] per-channel filter spectrum (f32)
    # bias_ref: (1, tc, 1)   per-channel bias (f32)
    # mask_ref: (1, 1, L)    position mask for this batch (f32)
    # fdh/fdl:  (L, 2*Fp)    hi/lo bf16 split of the forward DFT [cos | -sin]
    # idh/idl:  (2*Fp, L)    hi/lo bf16 split of the inverse DFT [w*cos ; -w*sin]
    fp = kri_ref.shape[-1] // 2

    x_in = x_ref[0]
    x = x_in.astype(jnp.float32)
    if x_in.dtype == jnp.bfloat16:
        x_hi, x_lo = x_in, None                  # already bf16: 2 MXU passes
    else:
        x_hi, x_lo = _split_bf16(x)

    # forward rfft (norm='forward'): one fused matmul -> [X_r | X_i]
    xri = _dot3(x_hi, x_lo, fdh_ref[...], fdl_ref[...])           # (tc, 2*fp) f32

    # pointwise complex multiply with the filter spectrum (kept in f32 on VPU)
    kri = kri_ref[...]
    xr, xi = xri[:, :fp], xri[:, fp:]
    kr, ki = kri[:, :fp], kri[:, fp:]
    yr = xr * kr - xi * ki
    yi = xr * ki + xi * kr
    yri = jnp.concatenate([yr, yi], axis=-1)                       # (tc, 2*fp)

    # unscaled inverse rfft truncated to the first L samples: one fused matmul
    y_hi, y_lo = _split_bf16(yri)
    y = _dot3(y_hi, y_lo, idh_ref[...], idl_ref[...])              # (tc, L) f32

    y = y + x * bias_ref[0]                                        # + inputs * bias
    y = y * mask_ref[0]                                            # position mask
    o_ref[0] = y.astype(o_ref.dtype)


def _const_spec(block_shape, index_map, single_buffer):
    """BlockSpec for a grid-invariant operand; single-buffer it when supported."""
    if single_buffer:
        try:
            return pl.BlockSpec(block_shape, index_map, pipeline_mode=pl.Buffered(1))
        except Exception:          # older jax without pipeline_mode / Buffered
            pass
    return pl.BlockSpec(block_shape, index_map)


@functools.partial(jax.jit, static_argnames=("channel_tile", "single_buffer_consts"))
def fft_long_conv(inputs, filters, bias, positions, *,
                  channel_tile=None, single_buffer_consts=True):
    """inputs: (B, H, D, L), filters: (H, D, Lf), bias: (n_order, 1, D, 1),
    positions: (B, L)  ->  (B, H, D, L)."""
    B, H, D, L = inputs.shape
    Hf, Df, Lf = filters.shape
    assert (Hf, Df) == (H, D), "filters must match (num_heads, head_dim)"
    HD = H * D

    n = next_fast_len(Lf + 1)                 # fft_length of the PyTorch module
    assert n >= L, "fft length must cover the input length"
    F = n // 2 + 1
    Fp = _round_up(F, 128)                    # lane-align the frequency axis

    # ---- constant DFT matrices (fused cos|sin, bf16 hi/lo split) ----
    fdft, idft = _dft_matrices(L, n, Fp)
    fdh, fdl = _split_bf16(fdft)
    idh, idl = _split_bf16(idft)

    # ---- filter spectrum K = rfft(filters, n, norm='forward'): exact XLA dot ----
    tk = jnp.arange(Lf, dtype=jnp.float32)
    ff = jnp.arange(F, dtype=jnp.float32)
    ang_k = (2.0 * jnp.pi / n) * tk[:, None] * ff[None, :]
    filt = filters.reshape(HD, Lf).astype(jnp.float32)
    kr = jnp.dot(filt, jnp.cos(ang_k) / n, precision=lax.Precision.HIGHEST)
    ki = jnp.dot(filt, -jnp.sin(ang_k) / n, precision=lax.Precision.HIGHEST)
    kri = jnp.zeros((HD, 2 * Fp), jnp.float32)
    kri = kri.at[:, :F].set(kr).at[:, Fp:Fp + F].set(ki)

    # ---- channel tiling: pad HD rather than shrinking the tile below 128 ----
    if channel_tile is None:
        tc, hd_pad = _pick_channel_tile(HD)
    else:
        tc = int(channel_tile)
        hd_pad = _round_up(HD, tc)
    assert tc == hd_pad or tc % 8 == 0, "channel tile must be a multiple of 8"
    nct = hd_pad // tc

    x3 = inputs.reshape(B, HD, L)             # native dtype: no host-side f32 cast
    bias3 = jnp.broadcast_to(bias, (B, H, D, 1)).reshape(B, HD, 1).astype(jnp.float32)
    mask3 = (positions != -1).astype(jnp.float32).reshape(B, 1, L)
    if hd_pad != HD:
        pad = hd_pad - HD
        x3 = jnp.pad(x3, ((0, 0), (0, pad), (0, 0)))
        bias3 = jnp.pad(bias3, ((0, 0), (0, pad), (0, 0)))
        kri = jnp.pad(kri, ((0, pad), (0, 0)))

    # ---- VMEM budget + advisory cost estimate ----
    xb = jnp.dtype(inputs.dtype).itemsize
    const_bytes = 2 * (L * 2 * Fp) * 2 + 2 * (2 * Fp * L) * 2          # 4 bf16 matrices
    step_bytes = (2 * tc * L * xb + 2 * tc * L * xb                    # x / out (double-buf)
                  + 2 * tc * 2 * Fp * 4 + 2 * tc * 4 + 2 * L * 4)      # kri / bias / mask
    temp_bytes = 12 * tc * Fp * 4 + 8 * tc * L * 4                     # in-kernel temporaries
    vmem_limit = int(min(max(3 * (const_bytes + step_bytes + temp_bytes) // 2
                             + (4 << 20), 32 << 20), 100 << 20))

    n_pass = 2 if inputs.dtype == jnp.bfloat16 else 3
    flops = 4 * B * hd_pad * L * Fp * (n_pass + 3) + 12 * B * hd_pad * Fp
    bytes_accessed = (2 * B * hd_pad * L * xb + hd_pad * 2 * Fp * 4
                      + const_bytes + B * hd_pad * 4 + B * L * 4)

    out3 = pl.pallas_call(
        _fft_conv_kernel,
        out_shape=jax.ShapeDtypeStruct((B, hd_pad, L), inputs.dtype),
        grid_spec=pltpu.PrefetchScalarGridSpec(
            num_scalar_prefetch=0,
            grid=(B, nct),
            in_specs=[
                pl.BlockSpec((1, tc, L), lambda b, c: (b, c, 0)),       # inputs
                pl.BlockSpec((tc, 2 * Fp), lambda b, c: (c, 0)),        # [K_r | K_i]
                pl.BlockSpec((1, tc, 1), lambda b, c: (b, c, 0)),       # bias
                pl.BlockSpec((1, 1, L), lambda b, c: (b, 0, 0)),        # mask
                _const_spec((L, 2 * Fp), lambda b, c: (0, 0), single_buffer_consts),
                _const_spec((L, 2 * Fp), lambda b, c: (0, 0), single_buffer_consts),
                _const_spec((2 * Fp, L), lambda b, c: (0, 0), single_buffer_consts),
                _const_spec((2 * Fp, L), lambda b, c: (0, 0), single_buffer_consts),
            ],
            out_specs=pl.BlockSpec((1, tc, L), lambda b, c: (b, c, 0))),
        compiler_params=pltpu.CompilerParams(
            dimension_semantics=("parallel", "parallel"),
            vmem_limit_bytes=vmem_limit),
        cost_estimate=pl.CostEstimate(flops=flops, transcendentals=0,
                                      bytes_accessed=bytes_accessed),
    )(x3, kri, bias3, mask3, fdh, fdl, idh, idl)

    if hd_pad != HD:
        out3 = out3[:, :HD, :]
    return out3.reshape(B, H, D, L)


def fft_long_conv_ref(inputs, filters, bias, positions):
    """float64 numpy reference mirroring the PyTorch forward exactly."""
    x = np.asarray(inputs, dtype=np.float64)
    f = np.asarray(filters, dtype=np.float64)[None]
    b = np.asarray(bias, dtype=np.float64)
    pos = np.asarray(positions)
    L = x.shape[-1]
    n = next_fast_len(f.shape[-1] + 1)
    Xf = np.fft.rfft(x, n=n, axis=-1, norm="forward")
    Kf = np.fft.rfft(f, n=n, axis=-1, norm="forward")
    y = np.fft.irfft(Xf * Kf, n=n, axis=-1, norm="forward")
    y = y[..., :L] + x * b
    mask = (pos != -1).astype(np.float64)[:, None, None, :]
    return y * mask


if __name__ == "__main__":
    batch, num_heads, head_dim, seq_len = 2, 4, 8, 16

    key = jax.random.PRNGKey(0)
    k1, k2, k3 = jax.random.split(key, 3)
    inputs = jax.random.normal(k1, (batch, num_heads, head_dim, seq_len), jnp.float32)
    filters = 0.1 * jax.random.normal(k2, (num_heads, head_dim, seq_len), jnp.float32)
    bias = jax.random.normal(k3, (1, 1, head_dim, 1), jnp.float32)
    positions = jnp.tile(jnp.arange(seq_len, dtype=jnp.int32)[None, :], (batch, 1))
    positions = positions.at[1, seq_len - 3:].set(-1)   # mask a few tail positions

    try:
        out = jax.block_until_ready(fft_long_conv(inputs, filters, bias, positions))
    except Exception:
        # Fallback for jax versions without pipeline_mode single-buffering support.
        out = jax.block_until_ready(
            fft_long_conv(inputs, filters, bias, positions, single_buffer_consts=False))

    ref = fft_long_conv_ref(inputs, filters, bias, positions)
    assert out.shape == (batch, num_heads, head_dim, seq_len)
    max_err = float(np.max(np.abs(np.asarray(out, np.float64) - ref)))
    assert max_err < 1e-3, f"mismatch vs FFT reference (max abs err {max_err})"

    print("KERNEL_OK")
</pallas_src>

<mosaic_0001>
module attributes {stable_mosaic.version = 11 : i64} {
  func.func @_fft_conv_kernel(%arg0: i32, %arg1: i32, %arg2: memref<1x32x16xf32, #tpu.memory_space<vmem>>, %arg3: memref<32x256xf32, #tpu.memory_space<vmem>>, %arg4: memref<1x32x1xf32, #tpu.memory_space<vmem>>, %arg5: memref<1x1x16xf32, #tpu.memory_space<vmem>>, %arg6: memref<16x256xbf16, #tpu.memory_space<vmem>>, %arg7: memref<16x256xbf16, #tpu.memory_space<vmem>>, %arg8: memref<256x16xbf16, #tpu.memory_space<vmem>>, %arg9: memref<256x16xbf16, #tpu.memory_space<vmem>>, %arg10: memref<1x32x16xf32, #tpu.memory_space<vmem>>) attributes {dimension_semantics = [#tpu.dimension_semantics<parallel>, #tpu.dimension_semantics<parallel>], iteration_bounds = array<i64: 2, 1>, scalar_prefetch = 0 : i64, scratch_operands = 0 : i64, tpu.core_type = #tpu.core_type<tc>, window_params = [{transform_indices = @transform_0, window_bounds = array<i64: 1, 32, 16>}, {transform_indices = @transform_1, window_bounds = array<i64: 32, 256>}, {transform_indices = @transform_2, window_bounds = array<i64: 1, 32, 1>}, {transform_indices = @transform_3, window_bounds = array<i64: 1, 1, 16>}, {pipeline_mode = #tpu.pipeline_mode<synchronous>, transform_indices = @transform_4, window_bounds = array<i64: 16, 256>}, {pipeline_mode = #tpu.pipeline_mode<synchronous>, transform_indices = @transform_5, window_bounds = array<i64: 16, 256>}, {pipeline_mode = #tpu.pipeline_mode<synchronous>, transform_indices = @transform_6, window_bounds = array<i64: 256, 16>}, {pipeline_mode = #tpu.pipeline_mode<synchronous>, transform_indices = @transform_7, window_bounds = array<i64: 256, 16>}, {transform_indices = @transform_8, window_bounds = array<i64: 1, 32, 16>}]} {
    %c0 = arith.constant 0 : index
    %c0_0 = arith.constant 0 : index
    %c0_1 = arith.constant 0 : index
    %0 = vector.load %arg2[%c0, %c0_0, %c0_1] : memref<1x32x16xf32, #tpu.memory_space<vmem>>, vector<1x32x16xf32>
    %1 = vector.shape_cast %0 : vector<1x32x16xf32> to vector<32x16xf32>
    %2 = arith.truncf %1 : vector<32x16xf32> to vector<32x16xbf16>
    %3 = arith.extf %2 : vector<32x16xbf16> to vector<32x16xf32>
    %4 = arith.subf %1, %3 : vector<32x16xf32>
    %5 = arith.truncf %4 : vector<32x16xf32> to vector<32x16xbf16>
    %c0_2 = arith.constant 0 : index
    %c0_3 = arith.constant 0 : index
    %6 = vector.load %arg6[%c0_2, %c0_3] : memref<16x256xbf16, #tpu.memory_space<vmem>>, vector<16x256xbf16>
    %c0_4 = arith.constant 0 : index
    %c0_5 = arith.constant 0 : index
    %7 = vector.load %arg7[%c0_4, %c0_5] : memref<16x256xbf16, #tpu.memory_space<vmem>>, vector<16x256xbf16>
    %cst = arith.constant dense<0.000000e+00> : vector<32x256xf32>
    %8 = tpu.matmul %2, %6, %cst {dimension_numbers = #tpu.dot_dimension_numbers<[1], [0], [0], [1], [0, 0, 1, 1], [], []>} : vector<32x16xbf16>, vector<16x256xbf16>, vector<32x256xf32> -> vector<32x256xf32>
    %cst_6 = arith.constant dense<0.000000e+00> : vector<32x256xf32>
    %9 = tpu.matmul %2, %7, %cst_6 {dimension_numbers = #tpu.dot_dimension_numbers<[1], [0], [0], [1], [0, 0, 1, 1], [], []>} : vector<32x16xbf16>, vector<16x256xbf16>, vector<32x256xf32> -> vector<32x256xf32>
    %10 = arith.addf %8, %9 : vector<32x256xf32>
    %cst_7 = arith.constant dense<0.000000e+00> : vector<32x256xf32>
    %11 = tpu.matmul %5, %6, %cst_7 {dimension_numbers = #tpu.dot_dimension_numbers<[1], [0], [0], [1], [0, 0, 1, 1], [], []>} : vector<32x16xbf16>, vector<16x256xbf16>, vector<32x256xf32> -> vector<32x256xf32>
    %12 = arith.addf %10, %11 : vector<32x256xf32>
    %c0_8 = arith.constant 0 : index
    %c0_9 = arith.constant 0 : index
    %13 = vector.load %arg3[%c0_8, %c0_9] : memref<32x256xf32, #tpu.memory_space<vmem>>, vector<32x256xf32>
    %14 = vector.extract_strided_slice %12 {offsets = [0, 0], sizes = [32, 128], strides = [1, 1]} : vector<32x256xf32> to vector<32x128xf32>
    %15 = vector.extract_strided_slice %12 {offsets = [0, 128], sizes = [32, 128], strides = [1, 1]} : vector<32x256xf32> to vector<32x128xf32>
    %16 = vector.extract_strided_slice %13 {offsets = [0, 0], sizes = [32, 128], strides = [1, 1]} : vector<32x256xf32> to vector<32x128xf32>
    %17 = vector.extract_strided_slice %13 {offsets = [0, 128], sizes = [32, 128], strides = [1, 1]} : vector<32x256xf32> to vector<32x128xf32>
    %18 = arith.mulf %14, %16 : vector<32x128xf32>
    %19 = arith.mulf %15, %17 : vector<32x128xf32>
    %20 = arith.subf %18, %19 : vector<32x128xf32>
    %21 = arith.mulf %14, %17 : vector<32x128xf32>
    %22 = arith.mulf %15, %16 : vector<32x128xf32>
    %23 = arith.addf %21, %22 : vector<32x128xf32>
    %24 = tpu.concatenate %20, %23 in 1 : vector<32x128xf32>, vector<32x128xf32> -> vector<32x256xf32>
    %25 = arith.truncf %24 : vector<32x256xf32> to vector<32x256xbf16>
    %26 = arith.extf %25 : vector<32x256xbf16> to vector<32x256xf32>
    %27 = arith.subf %24, %26 : vector<32x256xf32>
    %28 = arith.truncf %27 : vector<32x256xf32> to vector<32x256xbf16>
    %c0_10 = arith.constant 0 : index
    %c0_11 = arith.constant 0 : index
    %29 = vector.load %arg8[%c0_10, %c0_11] : memref<256x16xbf16, #tpu.memory_space<vmem>>, vector<256x16xbf16>
    %c0_12 = arith.constant 0 : index
    %c0_13 = arith.constant 0 : index
    %30 = vector.load %arg9[%c0_12, %c0_13] : memref<256x16xbf16, #tpu.memory_space<vmem>>, vector<256x16xbf16>
    %cst_14 = arith.constant dense<0.000000e+00> : vector<32x16xf32>
    %31 = tpu.matmul %25, %29, %cst_14 {dimension_numbers = #tpu.dot_dimension_numbers<[1], [0], [0], [1], [0, 0, 1, 1], [], []>} : vector<32x256xbf16>, vector<256x16xbf16>, vector<32x16xf32> -> vector<32x16xf32>
    %cst_15 = arith.constant dense<0.000000e+00> : vector<32x16xf32>
    %32 = tpu.matmul %25, %30, %cst_15 {dimension_numbers = #tpu.dot_dimension_numbers<[1], [0], [0], [1], [0, 0, 1, 1], [], []>} : vector<32x256xbf16>, vector<256x16xbf16>, vector<32x16xf32> -> vector<32x16xf32>
    %33 = arith.addf %31, %32 : vector<32x16xf32>
    %cst_16 = arith.constant dense<0.000000e+00> : vector<32x16xf32>
    %34 = tpu.matmul %28, %29, %cst_16 {dimension_numbers = #tpu.dot_dimension_numbers<[1], [0], [0], [1], [0, 0, 1, 1], [], []>} : vector<32x256xbf16>, vector<256x16xbf16>, vector<32x16xf32> -> vector<32x16xf32>
    %35 = arith.addf %33, %34 : vector<32x16xf32>
    %c0_17 = arith.constant 0 : index
    %c0_18 = arith.constant 0 : index
    %c0_19 = arith.constant 0 : index
    %36 = vector.load %arg4[%c0_17, %c0_18, %c0_19] : memref<1x32x1xf32, #tpu.memory_space<vmem>>, vector<1x32x1xf32>
    %37 = vector.shape_cast %36 : vector<1x32x1xf32> to vector<32x1xf32>
    %38 = vector.broadcast %37 : vector<32x1xf32> to vector<32x16xf32>
    %39 = arith.mulf %1, %38 : vector<32x16xf32>
    %40 = arith.addf %35, %39 : vector<32x16xf32>
    %c0_20 = arith.constant 0 : index
    %c0_21 = arith.constant 0 : index
    %c0_22 = arith.constant 0 : index
    %41 = vector.load %arg5[%c0_20, %c0_21, %c0_22] : memref<1x1x16xf32, #tpu.memory_space<vmem>>, vector<1x1x16xf32>
    %42 = vector.shape_cast %41 : vector<1x1x16xf32> to vector<1x16xf32>
    %43 = vector.broadcast %42 : vector<1x16xf32> to vector<32x16xf32>
    %44 = arith.mulf %40, %43 : vector<32x16xf32>
    %c0_23 = arith.constant 0 : index
    %c0_24 = arith.constant 0 : index
    %c0_25 = arith.constant 0 : index
    %45 = vector.load %arg10[%c0_23, %c0_24, %c0_25] : memref<1x32x16xf32, #tpu.memory_space<vmem>>, vector<1x32x16xf32>
    %46 = vector.shape_cast %45 : vector<1x32x16xf32> to vector<32x16xf32>
    %47 = vector.shape_cast %44 : vector<32x16xf32> to vector<1x32x16xf32>
    tpu.vector_store %arg10[%c0_23, %c0_24, %c0_25], %47 {strides = array<i32>} : memref<1x32x16xf32, #tpu.memory_space<vmem>>, vector<1x32x16xf32>,
    return
  }
  func.func @transform_0(%arg0: i32, %arg1: i32) -> (i32, i32, i32) {
    %c0_i32 = arith.constant 0 : i32
    %c0_i32_0 = arith.constant 0 : i32
    return %arg0, %arg1, %c0_i32 : i32, i32, i32
  }
  func.func @transform_1(%arg0: i32, %arg1: i32) -> (i32, i32) {
    %c0_i32 = arith.constant 0 : i32
    %c0_i32_0 = arith.constant 0 : i32
    return %arg1, %c0_i32 : i32, i32
  }
  func.func @transform_2(%arg0: i32, %arg1: i32) -> (i32, i32, i32) {
    %c0_i32 = arith.constant 0 : i32
    %c0_i32_0 = arith.constant 0 : i32
    return %arg0, %arg1, %c0_i32 : i32, i32, i32
  }
  func.func @transform_3(%arg0: i32, %arg1: i32) -> (i32, i32, i32) {
    %c0_i32 = arith.constant 0 : i32
    %c0_i32_0 = arith.constant 0 : i32
    %c0_i32_1 = arith.constant 0 : i32
    return %arg0, %c0_i32, %c0_i32_0 : i32, i32, i32
  }
  func.func @transform_4(%arg0: i32, %arg1: i32) -> (i32, i32) {
    %c0_i32 = arith.constant 0 : i32
    %c0_i32_0 = arith.constant 0 : i32
    %c0_i32_1 = arith.constant 0 : i32
    return %c0_i32, %c0_i32_0 : i32, i32
  }
  func.func @transform_5(%arg0: i32, %arg1: i32) -> (i32, i32) {
    %c0_i32 = arith.constant 0 : i32
    %c0_i32_0 = arith.constant 0 : i32
    %c0_i32_1 = arith.constant 0 : i32
    return %c0_i32, %c0_i32_0 : i32, i32
  }
  func.func @transform_6(%arg0: i32, %arg1: i32) -> (i32, i32) {
    %c0_i32 = arith.constant 0 : i32
    %c0_i32_0 = arith.constant 0 : i32
    %c0_i32_1 = arith.constant 0 : i32
    return %c0_i32, %c0_i32_0 : i32, i32
  }
  func.func @transform_7(%arg0: i32, %arg1: i32) -> (i32, i32) {
    %c0_i32 = arith.constant 0 : i32
    %c0_i32_0 = arith.constant 0 : i32
    %c0_i32_1 = arith.constant 0 : i32
    return %c0_i32, %c0_i32_0 : i32, i32
  }
  func.func @transform_8(%arg0: i32, %arg1: i32) -> (i32, i32, i32) {
    %c0_i32 = arith.constant 0 : i32
    %c0_i32_0 = arith.constant 0 : i32
    return %arg0, %arg1, %c0_i32 : i32, i32, i32
  }
}

module attributes {stable_mosaic.version = 11 : i64} {
  func.func @_fft_conv_kernel(%arg0: i32, %arg1: i32, %arg2: memref<1x32x16xf32, #tpu.memory_space<vmem>>, %arg3: memref<32x256xf32, #tpu.memory_space<vmem>>, %arg4: memref<1x32x1xf32, #tpu.memory_space<vmem>>, %arg5: memref<1x1x16xf32, #tpu.memory_space<vmem>>, %arg6: memref<16x256xbf16, #tpu.memory_space<vmem>>, %arg7: memref<16x256xbf16, #tpu.memory_space<vmem>>, %arg8: memref<256x16xbf16, #tpu.memory_space<vmem>>, %arg9: memref<256x16xbf16, #tpu.memory_space<vmem>>, %arg10: memref<1x32x16xf32, #tpu.memory_space<vmem>>) attributes {dimension_semantics = [#tpu.dimension_semantics<parallel>, #tpu.dimension_semantics<parallel>], iteration_bounds = array<i64: 2, 1>, scalar_prefetch = 0 : i64, scratch_operands = 0 : i64, tpu.core_type = #tpu.core_type<tc>, window_params = [{transform_indices = @transform_0, window_bounds = array<i64: 1, 32, 16>}, {transform_indices = @transform_1, window_bounds = array<i64: 32, 256>}, {transform_indices = @transform_2, window_bounds = array<i64: 1, 32, 1>}, {transform_indices = @transform_3, window_bounds = array<i64: 1, 1, 16>}, {pipeline_mode = #tpu.pipeline_mode<synchronous>, transform_indices = @transform_4, window_bounds = array<i64: 16, 256>}, {pipeline_mode = #tpu.pipeline_mode<synchronous>, transform_indices = @transform_5, window_bounds = array<i64: 16, 256>}, {pipeline_mode = #tpu.pipeline_mode<synchronous>, transform_indices = @transform_6, window_bounds = array<i64: 256, 16>}, {pipeline_mode = #tpu.pipeline_mode<synchronous>, transform_indices = @transform_7, window_bounds = array<i64: 256, 16>}, {transform_indices = @transform_8, window_bounds = array<i64: 1, 32, 16>}]} {
    %c0 = arith.constant 0 : index
    %c0_0 = arith.constant 0 : index
    %c0_1 = arith.constant 0 : index
    %0 = vector.load %arg2[%c0, %c0_0, %c0_1] : memref<1x32x16xf32, #tpu.memory_space<vmem>>, vector<1x32x16xf32>
    %1 = vector.shape_cast %0 : vector<1x32x16xf32> to vector<32x16xf32>
    %2 = arith.truncf %1 : vector<32x16xf32> to vector<32x16xbf16>
    %3 = arith.extf %2 : vector<32x16xbf16> to vector<32x16xf32>
    %4 = arith.subf %1, %3 : vector<32x16xf32>
    %5 = arith.truncf %4 : vector<32x16xf32> to vector<32x16xbf16>
    %c0_2 = arith.constant 0 : index
    %c0_3 = arith.constant 0 : index
    %6 = vector.load %arg6[%c0_2, %c0_3] : memref<16x256xbf16, #tpu.memory_space<vmem>>, vector<16x256xbf16>
    %c0_4 = arith.constant 0 : index
    %c0_5 = arith.constant 0 : index
    %7 = vector.load %arg7[%c0_4, %c0_5] : memref<16x256xbf16, #tpu.memory_space<vmem>>, vector<16x256xbf16>
    %cst = arith.constant dense<0.000000e+00> : vector<32x256xf32>
    %8 = tpu.matmul %2, %6, %cst {dimension_numbers = #tpu.dot_dimension_numbers<[1], [0], [0], [1], [0, 0, 1, 1], [], []>} : vector<32x16xbf16>, vector<16x256xbf16>, vector<32x256xf32> -> vector<32x256xf32>
    %cst_6 = arith.constant dense<0.000000e+00> : vector<32x256xf32>
    %9 = tpu.matmul %2, %7, %cst_6 {dimension_numbers = #tpu.dot_dimension_numbers<[1], [0], [0], [1], [0, 0, 1, 1], [], []>} : vector<32x16xbf16>, vector<16x256xbf16>, vector<32x256xf32> -> vector<32x256xf32>
    %10 = arith.addf %8, %9 : vector<32x256xf32>
    %cst_7 = arith.constant dense<0.000000e+00> : vector<32x256xf32>
    %11 = tpu.matmul %5, %6, %cst_7 {dimension_numbers = #tpu.dot_dimension_numbers<[1], [0], [0], [1], [0, 0, 1, 1], [], []>} : vector<32x16xbf16>, vector<16x256xbf16>, vector<32x256xf32> -> vector<32x256xf32>
    %12 = arith.addf %10, %11 : vector<32x256xf32>
    %c0_8 = arith.constant 0 : index
    %c0_9 = arith.constant 0 : index
    %13 = vector.load %arg3[%c0_8, %c0_9] : memref<32x256xf32, #tpu.memory_space<vmem>>, vector<32x256xf32>
    %14 = vector.extract_strided_slice %12 {offsets = [0, 0], sizes = [32, 128], strides = [1, 1]} : vector<32x256xf32> to vector<32x128xf32>
    %15 = vector.extract_strided_slice %12 {offsets = [0, 128], sizes = [32, 128], strides = [1, 1]} : vector<32x256xf32> to vector<32x128xf32>
    %16 = vector.extract_strided_slice %13 {offsets = [0, 0], sizes = [32, 128], strides = [1, 1]} : vector<32x256xf32> to vector<32x128xf32>
    %17 = vector.extract_strided_slice %13 {offsets = [0, 128], sizes = [32, 128], strides = [1, 1]} : vector<32x256xf32> to vector<32x128xf32>
    %18 = arith.mulf %14, %16 : vector<32x128xf32>
    %19 = arith.mulf %15, %17 : vector<32x128xf32>
    %20 = arith.subf %18, %19 : vector<32x128xf32>
    %21 = arith.mulf %14, %17 : vector<32x128xf32>
    %22 = arith.mulf %15, %16 : vector<32x128xf32>
    %23 = arith.addf %21, %22 : vector<32x128xf32>
    %24 = tpu.concatenate %20, %23 in 1 : vector<32x128xf32>, vector<32x128xf32> -> vector<32x256xf32>
    %25 = arith.truncf %24 : vector<32x256xf32> to vector<32x256xbf16>
    %26 = arith.extf %25 : vector<32x256xbf16> to vector<32x256xf32>
    %27 = arith.subf %24, %26 : vector<32x256xf32>
    %28 = arith.truncf %27 : vector<32x256xf32> to vector<32x256xbf16>
    %c0_10 = arith.constant 0 : index
    %c0_11 = arith.constant 0 : index
    %29 = vector.load %arg8[%c0_10, %c0_11] : memref<256x16xbf16, #tpu.memory_space<vmem>>, vector<256x16xbf16>
    %c0_12 = arith.constant 0 : index
    %c0_13 = arith.constant 0 : index
    %30 = vector.load %arg9[%c0_12, %c0_13] : memref<256x16xbf16, #tpu.memory_space<vmem>>, vector<256x16xbf16>
    %cst_14 = arith.constant dense<0.000000e+00> : vector<32x16xf32>
    %31 = tpu.matmul %25, %29, %cst_14 {dimension_numbers = #tpu.dot_dimension_numbers<[1], [0], [0], [1], [0, 0, 1, 1], [], []>} : vector<32x256xbf16>, vector<256x16xbf16>, vector<32x16xf32> -> vector<32x16xf32>
    %cst_15 = arith.constant dense<0.000000e+00> : vector<32x16xf32>
    %32 = tpu.matmul %25, %30, %cst_15 {dimension_numbers = #tpu.dot_dimension_numbers<[1], [0], [0], [1], [0, 0, 1, 1], [], []>} : vector<32x256xbf16>, vector<256x16xbf16>, vector<32x16xf32> -> vector<32x16xf32>
    %33 = arith.addf %31, %32 : vector<32x16xf32>
    %cst_16 = arith.constant dense<0.000000e+00> : vector<32x16xf32>
    %34 = tpu.matmul %28, %29, %cst_16 {dimension_numbers = #tpu.dot_dimension_numbers<[1], [0], [0], [1], [0, 0, 1, 1], [], []>} : vector<32x256xbf16>, vector<256x16xbf16>, vector<32x16xf32> -> vector<32x16xf32>
    %35 = arith.addf %33, %34 : vector<32x16xf32>
    %c0_17 = arith.constant 0 : index
    %c0_18 = arith.constant 0 : index
    %c0_19 = arith.constant 0 : index
    %36 = vector.load %arg4[%c0_17, %c0_18, %c0_19] : memref<1x32x1xf32, #tpu.memory_space<vmem>>, vector<1x32x1xf32>
    %37 = vector.shape_cast %36 : vector<1x32x1xf32> to vector<32x1xf32>
    %38 = vector.broadcast %37 : vector<32x1xf32> to vector<32x16xf32>
    %39 = arith.mulf %1, %38 : vector<32x16xf32>
    %40 = arith.addf %35, %39 : vector<32x16xf32>
    %c0_20 = arith.constant 0 : index
    %c0_21 = arith.constant 0 : index
    %c0_22 = arith.constant 0 : index
    %41 = vector.load %arg5[%c0_20, %c0_21, %c0_22] : memref<1x1x16xf32, #tpu.memory_space<vmem>>, vector<1x1x16xf32>
    %42 = vector.shape_cast %41 : vector<1x1x16xf32> to vector<1x16xf32>
    %43 = vector.broadcast %42 : vector<1x16xf32> to vector<32x16xf32>
    %44 = arith.mulf %40, %43 : vector<32x16xf32>
    %c0_23 = arith.constant 0 : index
    %c0_24 = arith.constant 0 : index
    %c0_25 = arith.constant 0 : index
    %45 = vector.load %arg10[%c0_23, %c0_24, %c0_25] : memref<1x32x16xf32, #tpu.memory_space<vmem>>, vector<1x32x16xf32>
    %46 = vector.shape_cast %45 : vector<1x32x16xf32> to vector<32x16xf32>
    %47 = vector.shape_cast %44 : vector<32x16xf32> to vector<1x32x16xf32>
    tpu.vector_store %arg10[%c0_23, %c0_24, %c0_25], %47 {strides = array<i32>} : memref<1x32x16xf32, #tpu.memory_space<vmem>>, vector<1x32x16xf32>,
    return
  }
  func.func @transform_0(%arg0: i32, %arg1: i32) -> (i32, i32, i32) {
    %c0_i32 = arith.constant 0 : i32
    %c0_i32_0 = arith.constant 0 : i32
    return %arg0, %arg1, %c0_i32 : i32, i32, i32
  }
  func.func @transform_1(%arg0: i32, %arg1: i32) -> (i32, i32) {
    %c0_i32 = arith.constant 0 : i32
    %c0_i32_0 = arith.constant 0 : i32
    return %arg1, %c0_i32 : i32, i32
  }
  func.func @transform_2(%arg0: i32, %arg1: i32) -> (i32, i32, i32) {
    %c0_i32 = arith.constant 0 : i32
    %c0_i32_0 = arith.constant 0 : i32
    return %arg0, %arg1, %c0_i32 : i32, i32, i32
  }
  func.func @transform_3(%arg0: i32, %arg1: i32) -> (i32, i32, i32) {
    %c0_i32 = arith.constant 0 : i32
    %c0_i32_0 = arith.constant 0 : i32
    %c0_i32_1 = arith.constant 0 : i32
    return %arg0, %c0_i32, %c0_i32_0 : i32, i32, i32
  }
  func.func @transform_4(%arg0: i32, %arg1: i32) -> (i32, i32) {
    %c0_i32 = arith.constant 0 : i32
    %c0_i32_0 = arith.constant 0 : i32
    %c0_i32_1 = arith.constant 0 : i32
    return %c0_i32, %c0_i32_0 : i32, i32
  }
  func.func @transform_5(%arg0: i32, %arg1: i32) -> (i32, i32) {
    %c0_i32 = arith.constant 0 : i32
    %c0_i32_0 = arith.constant 0 : i32
    %c0_i32_1 = arith.constant 0 : i32
    return %c0_i32, %c0_i32_0 : i32, i32
  }
  func.func @transform_6(%arg0: i32, %arg1: i32) -> (i32, i32) {
    %c0_i32 = arith.constant 0 : i32
    %c0_i32_0 = arith.constant 0 : i32
    %c0_i32_1 = arith.constant 0 : i32
    return %c0_i32, %c0_i32_0 : i32, i32
  }
  func.func @transform_7(%arg0: i32, %arg1: i32) -> (i32, i32) {
    %c0_i32 = arith.constant 0 : i32
    %c0_i32_0 = arith.constant 0 : i32
    %c0_i32_1 = arith.constant 0 : i32
    return %c0_i32, %c0_i32_0 : i32, i32
  }
  func.func @transform_8(%arg0: i32, %arg1: i32) -> (i32, i32, i32) {
    %c0_i32 = arith.constant 0 : i32
    %c0_i32_0 = arith.constant 0 : i32
    return %arg0, %arg1, %c0_i32 : i32, i32, i32
  }
}

</mosaic_0001>

<bundles_post_ra>
// kernel: fft_long_conv.1
= control target key start
LH: loop header
LB: loop body
LE: loop exit
PB: predicated region body
PF: predicated region fallthrough
CT: control target
= control target key end

     0   :  { %13 = vsyncpa [#allocation3], 0  ;;  %s2036_s0 = inlined_call_operand.vmem [shape: f32[2,32,16], index: 0, kind: input, shape index: {}]   ;;  %s2037_s1 = inlined_call_operand.vmem [shape: f32[32,256], index: 1, kind: input, shape index: {}]   ;;  %s2038_s2 = inlined_call_operand.vmem [shape: f32[2,32,1], index: 2, kind: input, shape index: {}]   ;;  %s2039_s3 = inlined_call_operand.vmem [shape: f32[2,1,16], index: 3, kind: input, shape index: {}]   ;;  %s2040_s4 = inlined_call_operand.vmem [shape: bf16[16,256], index: 4, kind: input, shape index: {}]   ;;  %s2041_s5 = inlined_call_operand.vmem [shape: bf16[16,256], index: 5, kind: input, shape index: {}]   ;;  %s2042_s6 = inlined_call_operand.vmem [shape: bf16[256,16], index: 6, kind: input, shape index: {}]   ;;  %s2043_s7 = inlined_call_operand.vmem [shape: bf16[256,16], index: 7, kind: input, shape index: {}]   ;;  %s2044_s8 = inlined_call_operand.hbm [shape: f32[2,32,16], index: 8, kind: output, shape index: {}]  }
   0x1   :  { %15 = vsyncpa [#allocation3 + $0x1], 0  ;;  %s1667_s27 = smov 0   ;;  %s1669_s28 = smov 0  }
   0x2   :  { %s1671_s29 = smov 0   ;;  %s1673_s30 = smov 0  }
   0x3   :  { %s1675_s9 = smov 0   ;;  %s1677_s10 = smov 0  }
   0x4 LB: > { %s1278_s11 = sadd.s32 4294967295, %s1616_s10   ;;  %s1279_s12 = sadd.s32 4294967294, %s1616_s10   ;;  %s1616_s10 = sphi %s1677_s10, %s21_s10   ;;  %s1612_s9 = sphi %s1675_s9, %s2051_s9   ;;  %s1608_s30 = sphi %s1673_s30, %s2050_s30   ;;  %s1604_s29 = sphi %s1671_s29, %s2049_s29   ;;  %s1600_s28 = sphi %s1669_s28, %s2048_s28   ;;  %s1596_s27 = sphi %s1667_s27, %s2047_s27  }
   0x5   : > { %s33_s13 = sadd.s32 1, %s1612_s9  ;;  %s234_s14 = sadd.s32 1, %s1604_s29 }
   0x6   : > { %p35_p0 = scmp.ge.s32.totalorder %s33_s13, 2  ;;  %p244_p1 = scmp.ne.s32.totalorder %s1604_s29, %s1600_s28 }
   0x7   : > { %p245_p2 = scmp.eq.s32.totalorder %s1278_s11, 1  ;;  %p250_p3 = scmp.ne.s32.totalorder %s1600_s28, %s1596_s27 }
   0x8   : > { %s2053_s13 = smov (%p35_p0, %s33_s13), 0  ;;  %p251_p5 = scmp.eq.s32.totalorder %s1279_s12, 1 }
   0x9   : > { %p1707_p4 = por %p245_p2, %p244_p1  ;;  %s229_s16 = ssub.s32 %s1612_s9, %s2053_s13 }
   0xa   : > { %p1283_p6 = scmp.ge.s32.totalorder %s1616_s10, 1  ;;  %p232_p7 = scmp.eq.s32.totalorder %s229_s16, 0 }
   0xb   : > { %p1714_p8 = por %p251_p5, %p250_p3  ;;  %p323_p9 = scmp.lt.s32.totalorder %s1616_s10, 3 }
   0xc   : > { %s1720_s18 = scalar_select %p232_p7, %s1604_s29, %s234_s14  }
   0xd   : > { %p324_p10 = pnand %p1283_p6, %p323_p9 }
   0xe   : > { %v1500_v0 = vld [vmem:[%s2041_s5 + $0x4] ss:$8 sps:$4 sm:$0xff] (!%p324_p10)   ;;  %p380_p11 = scmp.lt.s32.totalorder (!%p324_p10), %s1608_s30, 1  ;;  %v1502_v1 = vld [vmem:[%s2041_s5] ss:$8 sps:$4 sm:$0xff] (!%p324_p10)   ;;  %v1618_v2 = vmov (!%p324_p10), 0  }
   0xf   : > { %327 = sbr.rel (%p324_p10) target bundleno = 564 (0x234), region = 52  ;;  %480 = vmatprep.mubr.bf16.mxu0 (!%p324_p10), %v1618_v2  ;;  %1498 = vset.pattern.permute.xlu0 (!%p324_p10), %v1618_v2  ;;  %v1505_v3 = vld [vmem:[%s2040_s4 + $0x4] ss:$8 sps:$4 sm:$0xff] (!%p324_p10)   ;;  %v1503_v7 = vld [vmem:[%s2040_s4] ss:$8 sps:$4 sm:$0xff] (!%p324_p10)   ;;  %vm441_vm0 = vcmask (!%p324_p10), 130048  }
  0x10   : > { %448 = vmatprep.subr.bf16.mxu0 (!%p324_p10), %v1500_v0  ;;  %v1506_v4 = vld [vmem:[%s2043_s7 + $0x40] sm:$0xff] (!%p324_p10)   ;;  %1499 = vset.pattern.permute.xlu1 (!%p324_p10), %v1618_v2  ;;  %v1508_v6 = vld [vmem:[%s2043_s7 + $0x48] sm:$0xff] (!%p324_p10)   ;;  %v1511_v13 = vld [vmem:[%s2043_s7 + $0x50] sm:$0xff] (!%p324_p10)   ;;  %s376_s23 = sand.u32 (!%p324_p10), 1, %s1600_s28  }
  0x11   : > { %449 = vmatpush1.bf16.msra.mxu0 (!%p324_p10), %v1502_v1  ;;  %1340 = vmatprep.subr.bf16.mxu1 (!%p324_p10), %v1506_v4  ;;  %v1507_v5 = vld [vmem:[%s2043_s7] sm:$0xff] (!%p324_p10)   ;;  %v1509_v11 = vld [vmem:[%s2043_s7 + $0x8] sm:$0xff] (!%p324_p10)   ;;  %v1513_v15 = vld [vmem:[%s2043_s7 + $0x10] sm:$0xff] (!%p324_p10)   ;;  %s1284_s11 = sshll.u32 (!%p324_p10), %s376_s23, 5 }
  0x12   : > { %511 = vmatprep.subr.bf16.mxu0 (!%p324_p10), %v1505_v3  ;;  %1341 = vmatpush3.bf16.msra.mxu1 (!%p324_p10), %v1507_v5  ;;  %v1515_v17 = vld [vmem:[%s2043_s7 + $0x58] sm:$0xff] (!%p324_p10)   ;;  %v1519_v19 = vld [vmem:[%s2043_s7 + $0x60] sm:$0xff] (!%p324_p10)   ;;  %v1523_v21 = vld [vmem:[%s2043_s7 + $0x68] sm:$0xff] (!%p324_p10)  }
  0x13   : > { %1342 = vmatprep.subr.bf16.mxu1 (!%p324_p10), %v1508_v6  ;;  %v1517_v18 = vld [vmem:[%s2043_s7 + $0x18] sm:$0xff] (!%p324_p10)   ;;  %v1521_v20 = vld [vmem:[%s2043_s7 + $0x20] sm:$0xff] (!%p324_p10)   ;;  %v1525_v23 = vld [vmem:[%s2043_s7 + $0x28] sm:$0xff] (!%p324_p10)  }
  0x14   : > { %v1510_v22 = vld [vmem:[%s2042_s6 + $0x40] sm:$0xff] (!%p324_p10)   ;;  %v1816_v32 = vld [vmem:[%s2042_s6 + $0x48] sm:$0xff] (!%p324_p10)   ;;  %v1832_v36 = vld [vmem:[%s2042_s6 + $0x50] sm:$0xff] (!%p324_p10)  }
  0x15   : > { %v1811_v31 = vld [vmem:[%s2042_s6] sm:$0xff] (!%p324_p10)   ;;  %v1826_v35 = vld [vmem:[%s2042_s6 + $0x8] sm:$0xff] (!%p324_p10)   ;;  %v1838_v38 = vld [vmem:[%s2042_s6 + $0x10] sm:$0xff] (!%p324_p10)  }
  0x16   : > { %s1735_s25 = scalar_select %p380_p11, %s1608_s30, 1  ;;  %1343 = vmatpush3.bf16.msra.mxu1 %v1509_v11  ;;  %v1844_v39 = vld [vmem:[%s2042_s6 + $0x58] sm:$0xff]   ;;  %v1858_v41 = vld [vmem:[%s2042_s6 + $0x60] sm:$0xff]   ;;  %v1527_v42 = vld [vmem:[%s2043_s7 + $0x70] sm:$0xff]  }
  0x17   : > { %1344 = vmatprep.subr.bf16.mxu1 %v1511_v13  ;;  %v1851_v40 = vld [vmem:[%s2042_s6 + $0x18] sm:$0xff]   ;;  %v1867_v43 = vld [vmem:[%s2042_s6 + $0x20] sm:$0xff]   ;;  %v1529_v44 = vld [vmem:[%s2043_s7 + $0x30] sm:$0xff]  }
  0x18   : > { %s1337_s12 = sshll.u32 %s1735_s25, 5  ;;  %v1876_v45 = vld [vmem:[%s2042_s6 + $0x68] sm:$0xff]   ;;  %v1531_v46 = vld [vmem:[%s2043_s7 + $0x78] sm:$0xff]   ;;  %v1894_v49 = vld [vmem:[%s2042_s6 + $0x70] sm:$0xff]   ;;  %s408_s26 = scalar_lea.vmem %s2039_s3, %s1735_s25 }
  0x19   : > { %s387_s21 = scalar_lea.vmem %s2036_s0, %s1337_s12  ;;  %v1884_v47 = vld [vmem:[%s2042_s6 + $0x28] sm:$0xff]   ;;  %v1533_v48 = vld [vmem:[%s2043_s7 + $0x38] sm:$0xff]   ;;  %v1899_v50 = vld [vmem:[%s2042_s6 + $0x30] sm:$0xff]   ;;  %s378_s25 = scalar_lea.vmem [#allocation2], %s1284_s11 }
  0x1a   : > { %v1756_v8 = vld [vmem:[%s387_s21] sm:$0xff]  ;;  %v1758_v9 = vld [vmem:[%s387_s21 + $0x8] sm:$0xff]  ;;  %v1765_v12 = vld [vmem:[%s387_s21 + $0x10] sm:$0xff]  ;;  %1345 = vmatpush3.bf16.msra.mxu1 %v1513_v15  ;;  %s1157_s14 = sshll.u32 %s378_s25, 4  ;;  %s1984_s14 = int_to_ptr.vmem [resolvable:$true] %s1157_s14 }
  0x1b   : > { %v415_v10 = vpack.c.bf16 %v1758_v9, %v1756_v8  ;;  %v1772_v14 = vld [vmem:[%s387_s21 + $0x18] sm:$0xff]  ;;  %1346 = vmatprep.subr.bf16.mxu1 %v1515_v17  ;;  %s404_s21 = scalar_lea.vmem %s2038_s2, %s1337_s12  ;;  %v631_v57 = vld [vmem:[%s2037_s1] sm:$0xff]  ;;  %v632_v58 = vld [vmem:[%s2037_s1 + $0x8] sm:$0xff]  ;;  %s1538_s22 = scalar_lea.vmem %s1984_s14, 512 }
  0x1c   : > { %v416_v16 = vpack.c.bf16 %v1772_v14, %v1765_v12  ;;  %v1906_v51 = vld [vmem:[%s2042_s6 + $0x78] sm:$0xff]   ;;  %v1094_v53 = vld [vmem:[%s404_s21] sm:$0xff]  ;;  %v1096_v54 = vld [vmem:[%s404_s21 + $0x10] sm:$0xff]  ;;  %p1539_p12 = scmp.ne.s32.totalorder %s1984_s14, %s1538_s22  ;;  %s1619_s12 = smov [#allocation2]  }
  0x1d   : > { %1291 = vmatmul.mubr.msk.bf16.vlgmr.msra.gmra.mrb[0].mxu0 %vm441_vm0, %v415_v10  ;;  %v417_v24 = vunpack.c.l.bf16 %v415_v10  ;;  %v418_v25 = vunpack.c.h.bf16 %v415_v10  ;;  %v1911_v52 = vld [vmem:[%s2042_s6 + $0x38] sm:$0xff]   ;;  %1100 = vperm.xlu0 %1498, %v1094_v53   ;;  %v1095_v55 = vld [vmem:[%s404_s21 + $0x8] sm:$0xff]  ;;  %v633_v60 = vld [vmem:[%s2037_s1 + $0x10] sm:$0xff]  ;;  %s1542_s24 = sshll.u32 %s1619_s12, 4  ;;  %s1543_s24 = int_to_ptr.vmem [resolvable:$false] %s1542_s24 }
  0x1e   : > { %512 = vmatpush1.bf16.msra.mxu0 %v1503_v7  ;;  %490 = vmatprep.mubr.bf16.mxu0 %v1618_v2  ;;  %v419_v29 = vunpack.c.l.bf16 %v416_v16  ;;  %v420_v30 = vunpack.c.h.bf16 %v416_v16  ;;  %v1097_v56 = vld [vmem:[%s404_s21 + $0x18] sm:$0xff]  ;;  %v635_v17 = vld [vmem:[%s2037_s1 + $0x20] sm:$0xff]  ;;  %s1339_s21 = sshll.u32 %s1608_s30, 9  ;;  %s1990_s30 = scalar_lea.sflag [#allocation3], %s376_s23 }
  0x1f   : > { %570 = vmatprep.subr.bf16.mxu0 %v1505_v3  ;;  %1347 = vmatpush3.bf16.msra.mxu1 %v1517_v18  ;;  %v421_v26 = vsub.f32 %v1756_v8, %v417_v24  ;;  %v422_v27 = vsub.f32 %v1758_v9, %v418_v25  ;;  %v634_v61 = vld [vmem:[%s2037_s1 + $0x18] sm:$0xff]  ;;  %v636_v18 = vld [vmem:[%s2037_s1 + $0x28] sm:$0xff]  ;;  %s1982_s20 = scalar_lea.hbm %s2044_s8, %s1339_s21  ;;  %p1540_p13 = pnand %p1539_p12, %p1707_p4 }
  0x20   : > { %1348 = vmatprep.subr.bf16.mxu1 %v1519_v19  ;;  %v423_v33 = vsub.f32 %v1765_v12, %v419_v29  ;;  %v424_v34 = vsub.f32 %v1772_v14, %v420_v30  ;;  %1110 = vperm.xlu1 %1499, %v1096_v54   ;;  %p1545_p1 = scmp.lt.s32.totalorder %s1984_s14, %s1543_s24 }
  0x21   : > { %v425_v28 = vpack.c.bf16 %v422_v27, %v421_v26  ;;  %1105 = vperm.xlu0 %1498, %v1095_v55   ;;  %p1541_p0 = pneg %p1540_p13 }
  0x22   : > { %v426_v37 = vpack.c.bf16 %v424_v34, %v423_v33 }
  0x23   : > { %1349 = vmatpush3.bf16.msra.mxu1 %v1521_v20 }
  0x24   : > { %1350 = vmatprep.subr.bf16.mxu1 %v1523_v21  ;;  %1115 = vperm.xlu1 %1499, %v1097_v56  }
  0x25   : > { %1292 = vmatmul.mubr.msk.bf16.gmra.mrb[4].mxu0 %vm441_vm0, %v416_v16 }
  0x26   : > { %543 = vmatprep.mubr.bf16.mxu0 %v1618_v2 }
  0x27   : > { %1351 = vmatpush3.bf16.msra.mxu1 %v1525_v23  ;;  %v638_v23 = vld [vmem:[%s2037_s1 + $0x38] sm:$0xff] }
  0x28   : > { %1352 = vmatprep.subr.bf16.mxu1 %v1527_v42 }
  0x2b   : > { %1353 = vmatpush3.bf16.msra.mxu1 %v1529_v44 }
  0x2c   : > { %1354 = vmatprep.subr.bf16.mxu1 %v1531_v46 }
  0x2d   : > { %1295 = vmatmul.mubr.msk.bf16.vlgmr.msra.gmra.mrb[0].mxu0 %vm441_vm0, %v415_v10 }
  0x2e   : > { %571 = vmatpush1.bf16.msra.mxu0 %v1503_v7  ;;  %553 = vmatprep.mubr.bf16.mxu0 %v1618_v2 }
  0x2f   : > { %1396 = vmatprep.subr.bf16.mxu0 %v1510_v22  ;;  %1355 = vmatpush3.bf16.msra.mxu1 %v1533_v48 }
  0x30   : > { %1368 = vmatprep.subr.bf16.mxu1 %v1510_v22  ;;  %v637_v22 = vld [vmem:[%s2037_s1 + $0x30] sm:$0xff] }
  0x35   : > { %1296 = vmatmul.mubr.msk.bf16.gmra.mrb[4].mxu0 %vm441_vm0, %v416_v16 }
  0x36   : > { %602 = vmatprep.mubr.bf16.mxu0 %v1618_v2 }
  0x3d   : > { %1297 = vmatmul.mubr.msk.bf16.vlgmr.msra.gmra.mrb[0].mxu0 %vm441_vm0, %v425_v28 }
  0x3e   : > { %612 = vmatprep.mubr.bf16.mxu0 %v1618_v2  ;;  %1397 = vmatpush3.bf16.msra.mxu0 %v1811_v31 }
  0x3f   : > { %1398 = vmatprep.subr.bf16.mxu0 %v1816_v32 }
  0x42   : > { %1399 = vmatpush3.bf16.msra.mxu0 %v1826_v35 }
  0x43   : > { %1400 = vmatprep.subr.bf16.mxu0 %v1832_v36 }
  0x45   : > { %1298 = vmatmul.mubr.msk.bf16.gmra.mrb[4].mxu0 %vm441_vm0, %v426_v37 }
  0x46   : > { %1401 = vmatpush3.bf16.msra.mxu0 %v1838_v38 }
  0x47   : > { %1402 = vmatprep.subr.bf16.mxu0 %v1844_v39 }
  0x4a   : > { %1403 = vmatpush3.bf16.msra.mxu0 %v1851_v40 }
  0x4b   : > { %1404 = vmatprep.subr.bf16.mxu0 %v1858_v41 }
  0x4e   : > { %1405 = vmatpush3.bf16.msra.mxu0 %v1867_v43 }
  0x4f   : > { %1406 = vmatprep.subr.bf16.mxu0 %v1876_v45 }
  0x52   : > { %1407 = vmatpush3.bf16.msra.mxu0 %v1884_v47 }
  0x53   : > { %1408 = vmatprep.subr.bf16.mxu0 %v1894_v49 }
  0x56   : > { %1409 = vmatpush3.bf16.msra.mxu0 %v1899_v50 }
  0x57   : > { %1410 = vmatprep.subr.bf16.mxu0 %v1906_v51 }
  0x5a   : > { %1411 = vmatpush3.bf16.msra.mxu0 %v1911_v52 }
 0x110   : > { %v604_v59 = vpop.f32.mrb[0].mxu0 }
 0x111   : > { %v639_v62 = vmul.f32 %v631_v57, %v604_v59  ;;  %v651_v63 = vmul.f32 %v632_v58, %v604_v59  ;;  %v606_v0 = vpop.f32.mrb[1].mxu0 }
 0x112   : > { %v643_v1 = vmul.f32 %v632_v58, %v606_v0  ;;  %v655_v2 = vmul.f32 %v631_v57, %v606_v0  ;;  %v608_v3 = vpop.f32.mrb[2].mxu0 }
 0x113   : > { %v640_v4 = vmul.f32 %v633_v60, %v608_v3  ;;  %v652_v5 = vmul.f32 %v634_v61, %v608_v3  ;;  %v610_v6 = vpop.f32.mrb[3].mxu0 }
 0x114   : > { %v647_v7 = vsub.f32 %v639_v62, %v643_v1  ;;  %v659_v10 = vadd.f32 %v655_v2, %v651_v63  ;;  %v644_v11 = vmul.f32 %v634_v61, %v610_v6  ;;  %v656_v13 = vmul.f32 %v633_v60, %v610_v6 }
 0x116   : > { %v648_v15 = vsub.f32 %v640_v4, %v644_v11  ;;  %v660_v16 = vadd.f32 %v656_v13, %v652_v5 }
 0x118   : > { %v1938_v19 = vpack.c.bf16 %v648_v15, %v647_v7  ;;  %v664_v20 = vpack.c.bf16 %v660_v16, %v659_v10  ;;  %v614_v21 = vpop.f32.mrb[4].mxu0 }
 0x119   : > { %v641_v24 = vmul.f32 %v635_v17, %v614_v21  ;;  %v653_v25 = vmul.f32 %v636_v18, %v614_v21  ;;  %v616_v26 = vpop.f32.mrb[5].mxu0 }
 0x11a   : > { %v667_v27 = vunpack.c.l.bf16 %v1938_v19  ;;  %v669_v28 = vunpack.c.h.bf16 %v1938_v19  ;;  %v670_v29 = vunpack.c.h.bf16 %v664_v20  ;;  %v645_v30 = vmul.f32 %v636_v18, %v616_v26  ;;  %v618_v33 = vpop.f32.mrb[6].mxu0  ;;  %879 = vmatprep.mubr.bf16.mxu1 %v664_v20 }
 0x11b   : > { %v657_v34 = vmul.f32 %v635_v17, %v616_v26  ;;  %v642_v37 = vmul.f32 %v637_v22, %v618_v33  ;;  %v654_v42 = vmul.f32 %v638_v23, %v618_v33  ;;  %v620_v44 = vpop.f32.mrb[7].mxu0  ;;  %880 = vmatmul.mubr.bf16.vlgmr.msra.gmra.mrb[0].mxu1 %v1938_v19  ;;  %v668_v46 = vunpack.c.l.bf16 %v664_v20 }
 0x11c   : > { %v675_v48 = vsub.f32 %v647_v7, %v667_v27  ;;  %v677_v53 = vsub.f32 %v648_v15, %v669_v28  ;;  %v678_v54 = vsub.f32 %v660_v16, %v670_v29  ;;  %v649_v55 = vsub.f32 %v641_v24, %v645_v30  ;;  %1369 = vmatpush3.bf16.msra.mxu1 %v1811_v31 }
 0x11d   : > { %v661_v56 = vadd.f32 %v657_v34, %v653_v25  ;;  %v646_v57 = vmul.f32 %v638_v23, %v620_v44  ;;  %v658_v58 = vmul.f32 %v637_v22, %v620_v44  ;;  %1370 = vmatprep.subr.bf16.mxu1 %v1816_v32  ;;  %v676_v59 = vsub.f32 %v659_v10, %v668_v46  ;;  %v1101_v25 = vpop.permute.xlu0 %1100 }
 0x11e   : > { %v683_v60 = vpack.c.bf16 %v677_v53, %v675_v48  ;;  %v1331_v53 = vld [vmem:[%s408_s26] ss:$0 sm:$0xff]  ;;  %s1544_s26 = scalar_lea.vmem %s1543_s24, 1024 }
 0x11f   : > { %v650_v61 = vsub.f32 %v642_v37, %v646_v57  ;;  %v662_v62 = vadd.f32 %v658_v58, %v654_v42  ;;  %v684_v63 = vpack.c.bf16 %v678_v54, %v676_v59  ;;  %v1118_v37 = vmul.f32 %v1101_v25, %v1756_v8  ;;  %v1111_v54 = vpop.permute.xlu1 %1110  ;;  %p1546_p2 = scmp.lt.s32.totalorder %s1544_s26, %s1538_s22 }
 0x120   : > { %1371 = vmatpush3.bf16.msra.mxu1 %v1826_v35 }
 0x121   : > { %v665_v0 = vpack.c.bf16 %v650_v61, %v649_v55  ;;  %v666_v1 = vpack.c.bf16 %v662_v62, %v661_v56  ;;  %1073 = vmatprep.mubr.bf16.mxu0 %v684_v63  ;;  %1372 = vmatprep.subr.bf16.mxu1 %v1832_v36  ;;  %v1106_v33 = vpop.permute.xlu0 %1105  ;;  %p1547_p3 = por %p1546_p2, %p1545_p1 }
 0x122   : > { %1074 = vmatmul.mubr.bf16.vlgmr.msra.gmra.mrb[8].mxu0 %v683_v60  ;;  %v1119_v48 = vmul.f32 %v1106_v33, %v1758_v9  ;;  %v1120_v9 = vmul.f32 %v1111_v54, %v1765_v12 }
 0x123   : > { %v673_v2 = vunpack.c.h.bf16 %v665_v0  ;;  %v674_v31 = vunpack.c.h.bf16 %v666_v1  ;;  %887 = vmatprep.mubr.bf16.mxu1 %v666_v1  ;;  %v672_v3 = vunpack.c.l.bf16 %v666_v1  ;;  %v671_v4 = vunpack.c.l.bf16 %v665_v0  ;;  %p1548_p5 = pnand %p1547_p3, %p1541_p0 }
 0x124   : > { %888 = vmatmul.mubr.bf16.gmra.mrb[4].mxu1 %v665_v0 }
 0x125   : > { %v681_v32 = vsub.f32 %v650_v61, %v673_v2  ;;  %v682_v5 = vsub.f32 %v662_v62, %v674_v31  ;;  %1373 = vmatpush3.bf16.msra.mxu1 %v1838_v38  ;;  %1024 = vmatprep.mubr.bf16.mxu1 %v664_v20  ;;  %v680_v6 = vsub.f32 %v661_v56, %v672_v3  ;;  %v1116_v2 = vpop.permute.xlu1 %1115 }
 0x126   : > { %1374 = vmatprep.subr.bf16.mxu1 %v1844_v39  ;;  %v679_v35 = vsub.f32 %v649_v55, %v671_v4 }
 0x127   : > { %v686_v7 = vpack.c.bf16 %v682_v5, %v680_v6 }
 0x128   : > { %v685_v10 = vpack.c.bf16 %v681_v32, %v679_v35  ;;  %v1121_v32 = vmul.f32 %v1116_v2, %v1772_v14 }
 0x129   : > { %1375 = vmatpush3.bf16.msra.mxu1 %v1851_v40  ;;  %1081 = vmatprep.mubr.bf16.mxu0 %v686_v7 }
 0x12a   : > { %1082 = vmatmul.mubr.bf16.gmra.mrb[12].mxu0 %v685_v10  ;;  %1376 = vmatprep.subr.bf16.mxu1 %v1858_v41 }
 0x12d   : > { %1377 = vmatpush3.bf16.msra.mxu1 %v1867_v43 }
 0x12e   : > { %1378 = vmatprep.subr.bf16.mxu1 %v1876_v45 }
 0x131   : > { %1379 = vmatpush3.bf16.msra.mxu1 %v1884_v47 }
 0x132   : > { %1380 = vmatprep.subr.bf16.mxu1 %v1894_v49 }
 0x135   : > { %1381 = vmatpush3.bf16.msra.mxu1 %v1899_v50 }
 0x136   : > { %1382 = vmatprep.subr.bf16.mxu1 %v1906_v51 }
 0x139   : > { %1383 = vmatpush3.bf16.msra.mxu1 %v1911_v52 }
 0x13c   : > { %1025 = vmatmul.mubr.bf16.vlgmr.msra.gmra.mrb[8].mxu1 %v1938_v19 }
 0x13d   : > { %1032 = vmatprep.mubr.bf16.mxu1 %v666_v1 }
 0x144   : > { %1033 = vmatmul.mubr.bf16.gmra.mrb[12].mxu1 %v665_v0 }
 0x1ee   : > { %v1356_v36 = vpop.f32.mrb[0].mxu1 }
 0x1ef   : > { %v1357_v38 = vpop.f32.mrb[1].mxu1 }
 0x1f0   : > { %v1358_v39 = vadd.f32 %v1357_v38, %v1356_v36  ;;  %v1359_v40 = vpop.f32.mrb[2].mxu1 }
 0x1f1   : > { %v1360_v41 = vpop.f32.mrb[3].mxu1 }
 0x1f2   : > { %v1361_v43 = vadd.f32 %v1360_v41, %v1359_v40 }
 0x1f5   : > { %v1412_v45 = vpop.f32.mrb[8].mxu0 }
 0x1f6   : > { %v1413_v47 = vpop.f32.mrb[9].mxu0 }
 0x1f7   : > { %v1414_v11 = vadd.f32 %v1413_v47, %v1412_v45  ;;  %v1362_v49 = vpop.f32.mrb[4].mxu1  ;;  %v1415_v13 = vpop.f32.mrb[10].mxu0 }
 0x1f8   : > { %v1363_v50 = vpop.f32.mrb[5].mxu1  ;;  %v1416_v15 = vpop.f32.mrb[11].mxu0 }
 0x1f9   : > { %v1364_v51 = vadd.f32 %v1363_v50, %v1362_v49  ;;  %v1417_v52 = vadd.f32 %v1416_v15, %v1415_v13  ;;  %v1365_v16 = vpop.f32.mrb[6].mxu1 }
 0x1fa   : > { %v1366_v17 = vpop.f32.mrb[7].mxu1 }
 0x1fb   : > { %v1367_v18 = vadd.f32 %v1366_v17, %v1365_v16 }
 0x1fd   : > { %v1418_v19 = vpop.f32.mrb[12].mxu0 }
 0x1fe   : > { %v1419_v20 = vpop.f32.mrb[13].mxu0 }
 0x1ff   : > { %v1420_v21 = vadd.f32 %v1419_v20, %v1418_v19  ;;  %v1421_v22 = vpop.f32.mrb[14].mxu0 }
 0x200   : > { %v1422_v23 = vpop.f32.mrb[15].mxu0 }
 0x201   : > { %v1423_v24 = vadd.f32 %v1422_v23, %v1421_v22 }
 0x20f   : > { %v1384_v26 = vpop.f32.mrb[8].mxu1 }
 0x210   : > { %v1385_v27 = vpop.f32.mrb[9].mxu1 }
 0x211   : > { %v1386_v28 = vadd.f32 %v1385_v27, %v1384_v26  ;;  %v1387_v29 = vpop.f32.mrb[10].mxu1 }
 0x212   : > { %v1388_v30 = vpop.f32.mrb[11].mxu1 }
 0x213   : > { %v1027_v34 = vadd.f32 %v1386_v28, %v1358_v39  ;;  %v1389_v42 = vadd.f32 %v1388_v30, %v1387_v29 }
 0x215   : > { %v1090_v44 = vadd.f32 %v1414_v11, %v1027_v34  ;;  %v1030_v46 = vadd.f32 %v1389_v42, %v1361_v43 }
 0x217   : > { %v1122_v55 = vadd.f32 %v1118_v37, %v1090_v44  ;;  %v1091_v56 = vadd.f32 %v1417_v52, %v1030_v46  ;;  %v1390_v57 = vpop.f32.mrb[12].mxu1 }
 0x218   : > { %v1391_v58 = vpop.f32.mrb[13].mxu1 }
 0x219   : > { %v1133_v59 = vmul.f32 %v1331_v53, %v1122_v55  ;;  %v1123_v60 = vadd.f32 %v1119_v48, %v1091_v56  ;;  %v1392_v61 = vadd.f32 %v1391_v58, %v1390_v57  ;;  %v1393_v62 = vpop.f32.mrb[14].mxu1 }
 0x21a   : > { %v1394_v63 = vpop.f32.mrb[15].mxu1 }
 0x21b   : > { %1137 = vst.msk [vmem:[%s378_s25] sm:$0xff] %vm441_vm0, %v1133_v59  ;;  %v1134_v8 = vmul.f32 %v1331_v53, %v1123_v60  ;;  %v1035_v0 = vadd.f32 %v1392_v61, %v1364_v51  ;;  %v1395_v1 = vadd.f32 %v1394_v63, %v1393_v62 }
 0x21d   : > { %1138 = vst.msk [vmem:[%s378_s25 + $0x8] sm:$0xff] %vm441_vm0, %v1134_v8  ;;  %v1092_v31 = vadd.f32 %v1420_v21, %v1035_v0  ;;  %v1038_v3 = vadd.f32 %v1395_v1, %v1367_v18 }
 0x21f   : > { %v1124_v4 = vadd.f32 %v1120_v9, %v1092_v31  ;;  %v1093_v5 = vadd.f32 %v1423_v24, %v1038_v3 }
 0x221   : > { %v1135_v6 = vmul.f32 %v1331_v53, %v1124_v4  ;;  %v1125_v35 = vadd.f32 %v1121_v32, %v1093_v5 }
 0x223   : > { %1139 = vst.msk [vmem:[%s378_s25 + $0x10] sm:$0xff] %vm441_vm0, %v1135_v6  ;;  %v1136_v12 = vmul.f32 %v1331_v53, %v1125_v35 }
 0x225   : > { %1140 = vst.msk [vmem:[%s378_s25 + $0x18] sm:$0xff] %vm441_vm0, %v1136_v12 }
 0x226   : > { %1551 = shalt.err (!%p1548_p5)
}
 0x227   : > { %s1552_s23 = scalar_lea.hbm %s1982_s20, 512  ;;  %s1556_s21 = scalar_lea.hbm %s2044_s8, 1024 }
 0x228   : > { %p1553_p6 = scmp.ne.s32.totalorder %s1982_s20, %s1552_s23  ;;  %p1557_p10 = scmp.lt.u32.totalorder %s1982_s20, %s2044_s8 }
 0x229   : > { %p1558_p11 = scmp.lt.u32.totalorder %s1556_s21, %s1552_s23  ;;  %p1560_p13 = scmp.lt.u32.totalorder %s1552_s23, %s1982_s20 }
 0x22a   : > { %p1554_p7 = pnand %p1553_p6, %p1707_p4 }
 0x22b   : > { %p1559_p12 = por %p1558_p11, %p1557_p10 }
 0x22c   : > { %p1555_p9 = pneg %p1554_p7 }
 0x22d   : > { %p1561_p0 = por %p1560_p13, %p1559_p12 }
 0x22f   : > { %p1562_p1 = pnand %p1561_p0, %p1555_p9 }
 0x231   : > { %1565 = shalt.err (!%p1562_p1)
}
 0x232   : > { %s1620_s22 = smov 128   ;;  %s1621_s12 = smov 8  }
 0x233   : > { %1440 = dma.vmem_to_hbm [thread:$0]  (%p1707_p4), %s1984_s14, 512, %s1982_s20, %s1990_s30, %s1620_s22, %s1620_s22, %s1621_s12  }
 0x234 PF: > { %p1446_p2 = scmp.ge.s32.totalorder %s1616_s10, 2  ;;  %s1172_s24 = sand.u32 1, %s1596_s27  }
 0x235   : > { %s1173_s26 = scalar_lea.sflag [#allocation3], %s1172_s24 }
 0x236   : > { %p1443_p3 = pnand %p1446_p2, %p1714_p8 }
 0x238   : > { %1591 = dma.done.wait (!%p1443_p3), %s1173_s26, 512  }
 0x239   : > { %1593 = vsyncadd (!%p1443_p3), %s1173_s26, 4294966784  ;;  %s21_s10 = sadd.s32 1, %s1616_s10   ;;  %s2047_s27 = smov %s1600_s28 }
 0x23a   : > { %p18_p5 = scmp.ge.s32.totalorder %s21_s10, 4   ;;  %s2048_s28 = smov %s1604_s29 }
 0x23b   : > { %s2049_s29 = smov %s1720_s18  ;;  %s2050_s30 = smov %s1612_s9 }
 0x23c   : > { %s2051_s9 = smov %s2053_s13  ;;  %20 = sbr.rel (!%p18_p5) target bundleno = 4 (0x4), region = 96 }
 0x243   :  { %1178 = vsyncpa [#allocation3], 1 }
 0x244   :  { %1180 = vsyncpa [#allocation3 + $0x1], 1 }

// kernel: fft_long_conv.1
= control target key start
LH: loop header
LB: loop body
LE: loop exit
PB: predicated region body
PF: predicated region fallthrough
CT: control target
= control target key end

     0   :  { %13 = vsyncpa [#allocation3], 0  ;;  %s2036_s0 = inlined_call_operand.vmem [shape: f32[2,32,16], index: 0, kind: input, shape index: {}]   ;;  %s2037_s1 = inlined_call_operand.vmem [shape: f32[32,256], index: 1, kind: input, shape index: {}]   ;;  %s2038_s2 = inlined_call_operand.vmem [shape: f32[2,32,1], index: 2, kind: input, shape index: {}]   ;;  %s2039_s3 = inlined_call_operand.vmem [shape: f32[2,1,16], index: 3, kind: input, shape index: {}]   ;;  %s2040_s4 = inlined_call_operand.vmem [shape: bf16[16,256], index: 4, kind: input, shape index: {}]   ;;  %s2041_s5 = inlined_call_operand.vmem [shape: bf16[16,256], index: 5, kind: input, shape index: {}]   ;;  %s2042_s6 = inlined_call_operand.vmem [shape: bf16[256,16], index: 6, kind: input, shape index: {}]   ;;  %s2043_s7 = inlined_call_operand.vmem [shape: bf16[256,16], index: 7, kind: input, shape index: {}]   ;;  %s2044_s8 = inlined_call_operand.hbm [shape: f32[2,32,16], index: 8, kind: output, shape index: {}]  }
   0x1   :  { %15 = vsyncpa [#allocation3 + $0x1], 0  ;;  %s1667_s27 = smov 0   ;;  %s1669_s28 = smov 0  }
   0x2   :  { %s1671_s29 = smov 0   ;;  %s1673_s30 = smov 0  }
   0x3   :  { %s1675_s9 = smov 0   ;;  %s1677_s10 = smov 0  }
   0x4 LB: > { %s1278_s11 = sadd.s32 4294967295, %s1616_s10   ;;  %s1279_s12 = sadd.s32 4294967294, %s1616_s10   ;;  %s1616_s10 = sphi %s1677_s10, %s21_s10   ;;  %s1612_s9 = sphi %s1675_s9, %s2051_s9   ;;  %s1608_s30 = sphi %s1673_s30, %s2050_s30   ;;  %s1604_s29 = sphi %s1671_s29, %s2049_s29   ;;  %s1600_s28 = sphi %s1669_s28, %s2048_s28   ;;  %s1596_s27 = sphi %s1667_s27, %s2047_s27  }
   0x5   : > { %s33_s13 = sadd.s32 1, %s1612_s9  ;;  %s234_s14 = sadd.s32 1, %s1604_s29 }
   0x6   : > { %p35_p0 = scmp.ge.s32.totalorder %s33_s13, 2  ;;  %p244_p1 = scmp.ne.s32.totalorder %s1604_s29, %s1600_s28 }
   0x7   : > { %p245_p2 = scmp.eq.s32.totalorder %s1278_s11, 1  ;;  %p250_p3 = scmp.ne.s32.totalorder %s1600_s28, %s1596_s27 }
   0x8   : > { %s2053_s13 = smov (%p35_p0, %s33_s13), 0  ;;  %p251_p5 = scmp.eq.s32.totalorder %s1279_s12, 1 }
   0x9   : > { %p1707_p4 = por %p245_p2, %p244_p1  ;;  %s229_s16 = ssub.s32 %s1612_s9, %s2053_s13 }
   0xa   : > { %p1283_p6 = scmp.ge.s32.totalorder %s1616_s10, 1  ;;  %p232_p7 = scmp.eq.s32.totalorder %s229_s16, 0 }
   0xb   : > { %p1714_p8 = por %p251_p5, %p250_p3  ;;  %p323_p9 = scmp.lt.s32.totalorder %s1616_s10, 3 }
   0xc   : > { %s1720_s18 = scalar_select %p232_p7, %s1604_s29, %s234_s14  }
   0xd   : > { %p324_p10 = pnand %p1283_p6, %p323_p9 }
   0xe   : > { %v1500_v0 = vld [vmem:[%s2041_s5 + $0x4] ss:$8 sps:$4 sm:$0xff] (!%p324_p10)   ;;  %p380_p11 = scmp.lt.s32.totalorder (!%p324_p10), %s1608_s30, 1  ;;  %v1502_v1 = vld [vmem:[%s2041_s5] ss:$8 sps:$4 sm:$0xff] (!%p324_p10)   ;;  %v1618_v2 = vmov (!%p324_p10), 0  }
   0xf   : > { %327 = sbr.rel (%p324_p10) target bundleno = 564 (0x234), region = 52  ;;  %480 = vmatprep.mubr.bf16.mxu0 (!%p324_p10), %v1618_v2  ;;  %1498 = vset.pattern.permute.xlu0 (!%p324_p10), %v1618_v2  ;;  %v1505_v3 = vld [vmem:[%s2040_s4 + $0x4] ss:$8 sps:$4 sm:$0xff] (!%p324_p10)   ;;  %v1503_v7 = vld [vmem:[%s2040_s4] ss:$8 sps:$4 sm:$0xff] (!%p324_p10)   ;;  %vm441_vm0 = vcmask (!%p324_p10), 130048  }
  0x10   : > { %448 = vmatprep.subr.bf16.mxu0 (!%p324_p10), %v1500_v0  ;;  %v1506_v4 = vld [vmem:[%s2043_s7 + $0x40] sm:$0xff] (!%p324_p10)   ;;  %1499 = vset.pattern.permute.xlu1 (!%p324_p10), %v1618_v2  ;;  %v1508_v6 = vld [vmem:[%s2043_s7 + $0x48] sm:$0xff] (!%p324_p10)   ;;  %v1511_v13 = vld [vmem:[%s2043_s7 + $0x50] sm:$0xff] (!%p324_p10)   ;;  %s376_s23 = sand.u32 (!%p324_p10), 1, %s1600_s28  }
  0x11   : > { %449 = vmatpush1.bf16.msra.mxu0 (!%p324_p10), %v1502_v1  ;;  %1340 = vmatprep.subr.bf16.mxu1 (!%p324_p10), %v1506_v4  ;;  %v1507_v5 = vld [vmem:[%s2043_s7] sm:$0xff] (!%p324_p10)   ;;  %v1509_v11 = vld [vmem:[%s2043_s7 + $0x8] sm:$0xff] (!%p324_p10)   ;;  %v1513_v15 = vld [vmem:[%s2043_s7 + $0x10] sm:$0xff] (!%p324_p10)   ;;  %s1284_s11 = sshll.u32 (!%p324_p10), %s376_s23, 5 }
  0x12   : > { %511 = vmatprep.subr.bf16.mxu0 (!%p324_p10), %v1505_v3  ;;  %1341 = vmatpush3.bf16.msra.mxu1 (!%p324_p10), %v1507_v5  ;;  %v1515_v17 = vld [vmem:[%s2043_s7 + $0x58] sm:$0xff] (!%p324_p10)   ;;  %v1519_v19 = vld [vmem:[%s2043_s7 + $0x60] sm:$0xff] (!%p324_p10)   ;;  %v1523_v21 = vld [vmem:[%s2043_s7 + $0x68] sm:$0xff] (!%p324_p10)  }
  0x13   : > { %1342 = vmatprep.subr.bf16.mxu1 (!%p324_p10), %v1508_v6  ;;  %v1517_v18 = vld [vmem:[%s2043_s7 + $0x18] sm:$0xff] (!%p324_p10)   ;;  %v1521_v20 = vld [vmem:[%s2043_s7 + $0x20] sm:$0xff] (!%p324_p10)   ;;  %v1525_v23 = vld [vmem:[%s2043_s7 + $0x28] sm:$0xff] (!%p324_p10)  }
  0x14   : > { %v1510_v22 = vld [vmem:[%s2042_s6 + $0x40] sm:$0xff] (!%p324_p10)   ;;  %v1816_v32 = vld [vmem:[%s2042_s6 + $0x48] sm:$0xff] (!%p324_p10)   ;;  %v1832_v36 = vld [vmem:[%s2042_s6 + $0x50] sm:$0xff] (!%p324_p10)  }
  0x15   : > { %v1811_v31 = vld [vmem:[%s2042_s6] sm:$0xff] (!%p324_p10)   ;;  %v1826_v35 = vld [vmem:[%s2042_s6 + $0x8] sm:$0xff] (!%p324_p10)   ;;  %v1838_v38 = vld [vmem:[%s2042_s6 + $0x10] sm:$0xff] (!%p324_p10)  }
  0x16   : > { %s1735_s25 = scalar_select %p380_p11, %s1608_s30, 1  ;;  %1343 = vmatpush3.bf16.msra.mxu1 %v1509_v11  ;;  %v1844_v39 = vld [vmem:[%s2042_s6 + $0x58] sm:$0xff]   ;;  %v1858_v41 = vld [vmem:[%s2042_s6 + $0x60] sm:$0xff]   ;;  %v1527_v42 = vld [vmem:[%s2043_s7 + $0x70] sm:$0xff]  }
  0x17   : > { %1344 = vmatprep.subr.bf16.mxu1 %v1511_v13  ;;  %v1851_v40 = vld [vmem:[%s2042_s6 + $0x18] sm:$0xff]   ;;  %v1867_v43 = vld [vmem:[%s2042_s6 + $0x20] sm:$0xff]   ;;  %v1529_v44 = vld [vmem:[%s2043_s7 + $0x30] sm:$0xff]  }
  0x18   : > { %s1337_s12 = sshll.u32 %s1735_s25, 5  ;;  %v1876_v45 = vld [vmem:[%s2042_s6 + $0x68] sm:$0xff]   ;;  %v1531_v46 = vld [vmem:[%s2043_s7 + $0x78] sm:$0xff]   ;;  %v1894_v49 = vld [vmem:[%s2042_s6 + $0x70] sm:$0xff]   ;;  %s408_s26 = scalar_lea.vmem %s2039_s3, %s1735_s25 }
  0x19   : > { %s387_s21 = scalar_lea.vmem %s2036_s0, %s1337_s12  ;;  %v1884_v47 = vld [vmem:[%s2042_s6 + $0x28] sm:$0xff]   ;;  %v1533_v48 = vld [vmem:[%s2043_s7 + $0x38] sm:$0xff]   ;;  %v1899_v50 = vld [vmem:[%s2042_s6 + $0x30] sm:$0xff]   ;;  %s378_s25 = scalar_lea.vmem [#allocation2], %s1284_s11 }
  0x1a   : > { %v1756_v8 = vld [vmem:[%s387_s21] sm:$0xff]  ;;  %v1758_v9 = vld [vmem:[%s387_s21 + $0x8] sm:$0xff]  ;;  %v1765_v12 = vld [vmem:[%s387_s21 + $0x10] sm:$0xff]  ;;  %1345 = vmatpush3.bf16.msra.mxu1 %v1513_v15  ;;  %s1157_s14 = sshll.u32 %s378_s25, 4  ;;  %s1984_s14 = int_to_ptr.vmem [resolvable:$true] %s1157_s14 }
  0x1b   : > { %v415_v10 = vpack.c.bf16 %v1758_v9, %v1756_v8  ;;  %v1772_v14 = vld [vmem:[%s387_s21 + $0x18] sm:$0xff]  ;;  %1346 = vmatprep.subr.bf16.mxu1 %v1515_v17  ;;  %s404_s21 = scalar_lea.vmem %s2038_s2, %s1337_s12  ;;  %v631_v57 = vld [vmem:[%s2037_s1] sm:$0xff]  ;;  %v632_v58 = vld [vmem:[%s2037_s1 + $0x8] sm:$0xff]  ;;  %s1538_s22 = scalar_lea.vmem %s1984_s14, 512 }
  0x1c   : > { %v416_v16 = vpack.c.bf16 %v1772_v14, %v1765_v12  ;;  %v1906_v51 = vld [vmem:[%s2042_s6 + $0x78] sm:$0xff]   ;;  %v1094_v53 = vld [vmem:[%s404_s21] sm:$0xff]  ;;  %v1096_v54 = vld [vmem:[%s404_s21 + $0x10] sm:$0xff]  ;;  %p1539_p12 = scmp.ne.s32.totalorder %s1984_s14, %s1538_s22  ;;  %s1619_s12 = smov [#allocation2]  }
  0x1d   : > { %1291 = vmatmul.mubr.msk.bf16.vlgmr.msra.gmra.mrb[0].mxu0 %vm441_vm0, %v415_v10  ;;  %v417_v24 = vunpack.c.l.bf16 %v415_v10  ;;  %v418_v25 = vunpack.c.h.bf16 %v415_v10  ;;  %v1911_v52 = vld [vmem:[%s2042_s6 + $0x38] sm:$0xff]   ;;  %1100 = vperm.xlu0 %1498, %v1094_v53   ;;  %v1095_v55 = vld [vmem:[%s404_s21 + $0x8] sm:$0xff]  ;;  %v633_v60 = vld [vmem:[%s2037_s1 + $0x10] sm:$0xff]  ;;  %s1542_s24 = sshll.u32 %s1619_s12, 4  ;;  %s1543_s24 = int_to_ptr.vmem [resolvable:$false] %s1542_s24 }
  0x1e   : > { %512 = vmatpush1.bf16.msra.mxu0 %v1503_v7  ;;  %490 = vmatprep.mubr.bf16.mxu0 %v1618_v2  ;;  %v419_v29 = vunpack.c.l.bf16 %v416_v16  ;;  %v420_v30 = vunpack.c.h.bf16 %v416_v16  ;;  %v1097_v56 = vld [vmem:[%s404_s21 + $0x18] sm:$0xff]  ;;  %v635_v17 = vld [vmem:[%s2037_s1 + $0x20] sm:$0xff]  ;;  %s1339_s21 = sshll.u32 %s1608_s30, 9  ;;  %s1990_s30 = scalar_lea.sflag [#allocation3], %s376_s23 }
  0x1f   : > { %570 = vmatprep.subr.bf16.mxu0 %v1505_v3  ;;  %1347 = vmatpush3.bf16.msra.mxu1 %v1517_v18  ;;  %v421_v26 = vsub.f32 %v1756_v8, %v417_v24  ;;  %v422_v27 = vsub.f32 %v1758_v9, %v418_v25  ;;  %v634_v61 = vld [vmem:[%s2037_s1 + $0x18] sm:$0xff]  ;;  %v636_v18 = vld [vmem:[%s2037_s1 + $0x28] sm:$0xff]  ;;  %s1982_s20 = scalar_lea.hbm %s2044_s8, %s1339_s21  ;;  %p1540_p13 = pnand %p1539_p12, %p1707_p4 }
  0x20   : > { %1348 = vmatprep.subr.bf16.mxu1 %v1519_v19  ;;  %v423_v33 = vsub.f32 %v1765_v12, %v419_v29  ;;  %v424_v34 = vsub.f32 %v1772_v14, %v420_v30  ;;  %1110 = vperm.xlu1 %1499, %v1096_v54   ;;  %p1545_p1 = scmp.lt.s32.totalorder %s1984_s14, %s1543_s24 }
  0x21   : > { %v425_v28 = vpack.c.bf16 %v422_v27, %v421_v26  ;;  %1105 = vperm.xlu0 %1498, %v1095_v55   ;;  %p1541_p0 = pneg %p1540_p13 }
  0x22   : > { %v426_v37 = vpack.c.bf16 %v424_v34, %v423_v33 }
  0x23   : > { %1349 = vmatpush3.bf16.msra.mxu1 %v1521_v20 }
  0x24   : > { %1350 = vmatprep.subr.bf16.mxu1 %v1523_v21  ;;  %1115 = vperm.xlu1 %1499, %v1097_v56  }
  0x25   : > { %1292 = vmatmul.mubr.msk.bf16.gmra.mrb[4].mxu0 %vm441_vm0, %v416_v16 }
  0x26   : > { %543 = vmatprep.mubr.bf16.mxu0 %v1618_v2 }
  0x27   : > { %1351 = vmatpush3.bf16.msra.mxu1 %v1525_v23  ;;  %v638_v23 = vld [vmem:[%s2037_s1 + $0x38] sm:$0xff] }
  0x28   : > { %1352 = vmatprep.subr.bf16.mxu1 %v1527_v42 }
  0x2b   : > { %1353 = vmatpush3.bf16.msra.mxu1 %v1529_v44 }
  0x2c   : > { %1354 = vmatprep.subr.bf16.mxu1 %v1531_v46 }
  0x2d   : > { %1295 = vmatmul.mubr.msk.bf16.vlgmr.msra.gmra.mrb[0].mxu0 %vm441_vm0, %v415_v10 }
  0x2e   : > { %571 = vmatpush1.bf16.msra.mxu0 %v1503_v7  ;;  %553 = vmatprep.mubr.bf16.mxu0 %v1618_v2 }
  0x2f   : > { %1396 = vmatprep.subr.bf16.mxu0 %v1510_v22  ;;  %1355 = vmatpush3.bf16.msra.mxu1 %v1533_v48 }
  0x30   : > { %1368 = vmatprep.subr.bf16.mxu1 %v1510_v22  ;;  %v637_v22 = vld [vmem:[%s2037_s1 + $0x30] sm:$0xff] }
  0x35   : > { %1296 = vmatmul.mubr.msk.bf16.gmra.mrb[4].mxu0 %vm441_vm0, %v416_v16 }
  0x36   : > { %602 = vmatprep.mubr.bf16.mxu0 %v1618_v2 }
  0x3d   : > { %1297 = vmatmul.mubr.msk.bf16.vlgmr.msra.gmra.mrb[0].mxu0 %vm441_vm0, %v425_v28 }
  0x3e   : > { %612 = vmatprep.mubr.bf16.mxu0 %v1618_v2  ;;  %1397 = vmatpush3.bf16.msra.mxu0 %v1811_v31 }
  0x3f   : > { %1398 = vmatprep.subr.bf16.mxu0 %v1816_v32 }
  0x42   : > { %1399 = vmatpush3.bf16.msra.mxu0 %v1826_v35 }
  0x43   : > { %1400 = vmatprep.subr.bf16.mxu0 %v1832_v36 }
  0x45   : > { %1298 = vmatmul.mubr.msk.bf16.gmra.mrb[4].mxu0 %vm441_vm0, %v426_v37 }
  0x46   : > { %1401 = vmatpush3.bf16.msra.mxu0 %v1838_v38 }
  0x47   : > { %1402 = vmatprep.subr.bf16.mxu0 %v1844_v39 }
  0x4a   : > { %1403 = vmatpush3.bf16.msra.mxu0 %v1851_v40 }
  0x4b   : > { %1404 = vmatprep.subr.bf16.mxu0 %v1858_v41 }
  0x4e   : > { %1405 = vmatpush3.bf16.msra.mxu0 %v1867_v43 }
  0x4f   : > { %1406 = vmatprep.subr.bf16.mxu0 %v1876_v45 }
  0x52   : > { %1407 = vmatpush3.bf16.msra.mxu0 %v1884_v47 }
  0x53   : > { %1408 = vmatprep.subr.bf16.mxu0 %v1894_v49 }
  0x56   : > { %1409 = vmatpush3.bf16.msra.mxu0 %v1899_v50 }
  0x57   : > { %1410 = vmatprep.subr.bf16.mxu0 %v1906_v51 }
  0x5a   : > { %1411 = vmatpush3.bf16.msra.mxu0 %v1911_v52 }
 0x110   : > { %v604_v59 = vpop.f32.mrb[0].mxu0 }
 0x111   : > { %v639_v62 = vmul.f32 %v631_v57, %v604_v59  ;;  %v651_v63 = vmul.f32 %v632_v58, %v604_v59  ;;  %v606_v0 = vpop.f32.mrb[1].mxu0 }
 0x112   : > { %v643_v1 = vmul.f32 %v632_v58, %v606_v0  ;;  %v655_v2 = vmul.f32 %v631_v57, %v606_v0  ;;  %v608_v3 = vpop.f32.mrb[2].mxu0 }
 0x113   : > { %v640_v4 = vmul.f32 %v633_v60, %v608_v3  ;;  %v652_v5 = vmul.f32 %v634_v61, %v608_v3  ;;  %v610_v6 = vpop.f32.mrb[3].mxu0 }
 0x114   : > { %v647_v7 = vsub.f32 %v639_v62, %v643_v1  ;;  %v659_v10 = vadd.f32 %v655_v2, %v651_v63  ;;  %v644_v11 = vmul.f32 %v634_v61, %v610_v6  ;;  %v656_v13 = vmul.f32 %v633_v60, %v610_v6 }
 0x116   : > { %v648_v15 = vsub.f32 %v640_v4, %v644_v11  ;;  %v660_v16 = vadd.f32 %v656_v13, %v652_v5 }
 0x118   : > { %v1938_v19 = vpack.c.bf16 %v648_v15, %v647_v7  ;;  %v664_v20 = vpack.c.bf16 %v660_v16, %v659_v10  ;;  %v614_v21 = vpop.f32.mrb[4].mxu0 }
 0x119   : > { %v641_v24 = vmul.f32 %v635_v17, %v614_v21  ;;  %v653_v25 = vmul.f32 %v636_v18, %v614_v21  ;;  %v616_v26 = vpop.f32.mrb[5].mxu0 }
 0x11a   : > { %v667_v27 = vunpack.c.l.bf16 %v1938_v19  ;;  %v669_v28 = vunpack.c.h.bf16 %v1938_v19  ;;  %v670_v29 = vunpack.c.h.bf16 %v664_v20  ;;  %v645_v30 = vmul.f32 %v636_v18, %v616_v26  ;;  %v618_v33 = vpop.f32.mrb[6].mxu0  ;;  %879 = vmatprep.mubr.bf16.mxu1 %v664_v20 }
 0x11b   : > { %v657_v34 = vmul.f32 %v635_v17, %v616_v26  ;;  %v642_v37 = vmul.f32 %v637_v22, %v618_v33  ;;  %v654_v42 = vmul.f32 %v638_v23, %v618_v33  ;;  %v620_v44 = vpop.f32.mrb[7].mxu0  ;;  %880 = vmatmul.mubr.bf16.vlgmr.msra.gmra.mrb[0].mxu1 %v1938_v19  ;;  %v668_v46 = vunpack.c.l.bf16 %v664_v20 }
 0x11c   : > { %v675_v48 = vsub.f32 %v647_v7, %v667_v27  ;;  %v677_v53 = vsub.f32 %v648_v15, %v669_v28  ;;  %v678_v54 = vsub.f32 %v660_v16, %v670_v29  ;;  %v649_v55 = vsub.f32 %v641_v24, %v645_v30  ;;  %1369 = vmatpush3.bf16.msra.mxu1 %v1811_v31 }
 0x11d   : > { %v661_v56 = vadd.f32 %v657_v34, %v653_v25  ;;  %v646_v57 = vmul.f32 %v638_v23, %v620_v44  ;;  %v658_v58 = vmul.f32 %v637_v22, %v620_v44  ;;  %1370 = vmatprep.subr.bf16.mxu1 %v1816_v32  ;;  %v676_v59 = vsub.f32 %v659_v10, %v668_v46  ;;  %v1101_v25 = vpop.permute.xlu0 %1100 }
 0x11e   : > { %v683_v60 = vpack.c.bf16 %v677_v53, %v675_v48  ;;  %v1331_v53 = vld [vmem:[%s408_s26] ss:$0 sm:$0xff]  ;;  %s1544_s26 = scalar_lea.vmem %s1543_s24, 1024 }
 0x11f   : > { %v650_v61 = vsub.f32 %v642_v37, %v646_v57  ;;  %v662_v62 = vadd.f32 %v658_v58, %v654_v42  ;;  %v684_v63 = vpack.c.bf16 %v678_v54, %v676_v59  ;;  %v1118_v37 = vmul.f32 %v1101_v25, %v1756_v8  ;;  %v1111_v54 = vpop.permute.xlu1 %1110  ;;  %p1546_p2 = scmp.lt.s32.totalorder %s1544_s26, %s1538_s22 }
 0x120   : > { %1371 = vmatpush3.bf16.msra.mxu1 %v1826_v35 }
 0x121   : > { %v665_v0 = vpack.c.bf16 %v650_v61, %v649_v55  ;;  %v666_v1 = vpack.c.bf16 %v662_v62, %v661_v56  ;;  %1073 = vmatprep.mubr.bf16.mxu0 %v684_v63  ;;  %1372 = vmatprep.subr.bf16.mxu1 %v1832_v36  ;;  %v1106_v33 = vpop.permute.xlu0 %1105  ;;  %p1547_p3 = por %p1546_p2, %p1545_p1 }
 0x122   : > { %1074 = vmatmul.mubr.bf16.vlgmr.msra.gmra.mrb[8].mxu0 %v683_v60  ;;  %v1119_v48 = vmul.f32 %v1106_v33, %v1758_v9  ;;  %v1120_v9 = vmul.f32 %v1111_v54, %v1765_v12 }
 0x123   : > { %v673_v2 = vunpack.c.h.bf16 %v665_v0  ;;  %v674_v31 = vunpack.c.h.bf16 %v666_v1  ;;  %887 = vmatprep.mubr.bf16.mxu1 %v666_v1  ;;  %v672_v3 = vunpack.c.l.bf16 %v666_v1  ;;  %v671_v4 = vunpack.c.l.bf16 %v665_v0  ;;  %p1548_p5 = pnand %p1547_p3, %p1541_p0 }
 0x124   : > { %888 = vmatmul.mubr.bf16.gmra.mrb[4].mxu1 %v665_v0 }
 0x125   : > { %v681_v32 = vsub.f32 %v650_v61, %v673_v2  ;;  %v682_v5 = vsub.f32 %v662_v62, %v674_v31  ;;  %1373 = vmatpush3.bf16.msra.mxu1 %v1838_v38  ;;  %1024 = vmatprep.mubr.bf16.mxu1 %v664_v20  ;;  %v680_v6 = vsub.f32 %v661_v56, %v672_v3  ;;  %v1116_v2 = vpop.permute.xlu1 %1115 }
 0x126   : > { %1374 = vmatprep.subr.bf16.mxu1 %v1844_v39  ;;  %v679_v35 = vsub.f32 %v649_v55, %v671_v4 }
 0x127   : > { %v686_v7 = vpack.c.bf16 %v682_v5, %v680_v6 }
 0x128   : > { %v685_v10 = vpack.c.bf16 %v681_v32, %v679_v35  ;;  %v1121_v32 = vmul.f32 %v1116_v2, %v1772_v14 }
 0x129   : > { %1375 = vmatpush3.bf16.msra.mxu1 %v1851_v40  ;;  %1081 = vmatprep.mubr.bf16.mxu0 %v686_v7 }
 0x12a   : > { %1082 = vmatmul.mubr.bf16.gmra.mrb[12].mxu0 %v685_v10  ;;  %1376 = vmatprep.subr.bf16.mxu1 %v1858_v41 }
 0x12d   : > { %1377 = vmatpush3.bf16.msra.mxu1 %v1867_v43 }
 0x12e   : > { %1378 = vmatprep.subr.bf16.mxu1 %v1876_v45 }
 0x131   : > { %1379 = vmatpush3.bf16.msra.mxu1 %v1884_v47 }
 0x132   : > { %1380 = vmatprep.subr.bf16.mxu1 %v1894_v49 }
 0x135   : > { %1381 = vmatpush3.bf16.msra.mxu1 %v1899_v50 }
 0x136   : > { %1382 = vmatprep.subr.bf16.mxu1 %v1906_v51 }
 0x139   : > { %1383 = vmatpush3.bf16.msra.mxu1 %v1911_v52 }
 0x13c   : > { %1025 = vmatmul.mubr.bf16.vlgmr.msra.gmra.mrb[8].mxu1 %v1938_v19 }
 0x13d   : > { %1032 = vmatprep.mubr.bf16.mxu1 %v666_v1 }
 0x144   : > { %1033 = vmatmul.mubr.bf16.gmra.mrb[12].mxu1 %v665_v0 }
 0x1ee   : > { %v1356_v36 = vpop.f32.mrb[0].mxu1 }
 0x1ef   : > { %v1357_v38 = vpop.f32.mrb[1].mxu1 }
 0x1f0   : > { %v1358_v39 = vadd.f32 %v1357_v38, %v1356_v36  ;;  %v1359_v40 = vpop.f32.mrb[2].mxu1 }
 0x1f1   : > { %v1360_v41 = vpop.f32.mrb[3].mxu1 }
 0x1f2   : > { %v1361_v43 = vadd.f32 %v1360_v41, %v1359_v40 }
 0x1f5   : > { %v1412_v45 = vpop.f32.mrb[8].mxu0 }
 0x1f6   : > { %v1413_v47 = vpop.f32.mrb[9].mxu0 }
 0x1f7   : > { %v1414_v11 = vadd.f32 %v1413_v47, %v1412_v45  ;;  %v1362_v49 = vpop.f32.mrb[4].mxu1  ;;  %v1415_v13 = vpop.f32.mrb[10].mxu0 }
 0x1f8   : > { %v1363_v50 = vpop.f32.mrb[5].mxu1  ;;  %v1416_v15 = vpop.f32.mrb[11].mxu0 }
 0x1f9   : > { %v1364_v51 = vadd.f32 %v1363_v50, %v1362_v49  ;;  %v1417_v52 = vadd.f32 %v1416_v15, %v1415_v13  ;;  %v1365_v16 = vpop.f32.mrb[6].mxu1 }
 0x1fa   : > { %v1366_v17 = vpop.f32.mrb[7].mxu1 }
 0x1fb   : > { %v1367_v18 = vadd.f32 %v1366_v17, %v1365_v16 }
 0x1fd   : > { %v1418_v19 = vpop.f32.mrb[12].mxu0 }
 0x1fe   : > { %v1419_v20 = vpop.f32.mrb[13].mxu0 }
 0x1ff   : > { %v1420_v21 = vadd.f32 %v1419_v20, %v1418_v19  ;;  %v1421_v22 = vpop.f32.mrb[14].mxu0 }
 0x200   : > { %v1422_v23 = vpop.f32.mrb[15].mxu0 }
 0x201   : > { %v1423_v24 = vadd.f32 %v1422_v23, %v1421_v22 }
 0x20f   : > { %v1384_v26 = vpop.f32.mrb[8].mxu1 }
 0x210   : > { %v1385_v27 = vpop.f32.mrb[9].mxu1 }
 0x211   : > { %v1386_v28 = vadd.f32 %v1385_v27, %v1384_v26  ;;  %v1387_v29 = vpop.f32.mrb[10].mxu1 }
 0x212   : > { %v1388_v30 = vpop.f32.mrb[11].mxu1 }
 0x213   : > { %v1027_v34 = vadd.f32 %v1386_v28, %v1358_v39  ;;  %v1389_v42 = vadd.f32 %v1388_v30, %v1387_v29 }
 0x215   : > { %v1090_v44 = vadd.f32 %v1414_v11, %v1027_v34  ;;  %v1030_v46 = vadd.f32 %v1389_v42, %v1361_v43 }
 0x217   : > { %v1122_v55 = vadd.f32 %v1118_v37, %v1090_v44  ;;  %v1091_v56 = vadd.f32 %v1417_v52, %v1030_v46  ;;  %v1390_v57 = vpop.f32.mrb[12].mxu1 }
 0x218   : > { %v1391_v58 = vpop.f32.mrb[13].mxu1 }
 0x219   : > { %v1133_v59 = vmul.f32 %v1331_v53, %v1122_v55  ;;  %v1123_v60 = vadd.f32 %v1119_v48, %v1091_v56  ;;  %v1392_v61 = vadd.f32 %v1391_v58, %v1390_v57  ;;  %v1393_v62 = vpop.f32.mrb[14].mxu1 }
 0x21a   : > { %v1394_v63 = vpop.f32.mrb[15].mxu1 }
 0x21b   : > { %1137 = vst.msk [vmem:[%s378_s25] sm:$0xff] %vm441_vm0, %v1133_v59  ;;  %v1134_v8 = vmul.f32 %v1331_v53, %v1123_v60  ;;  %v1035_v0 = vadd.f32 %v1392_v61, %v1364_v51  ;;  %v1395_v1 = vadd.f32 %v1394_v63, %v1393_v62 }
 0x21d   : > { %1138 = vst.msk [vmem:[%s378_s25 + $0x8] sm:$0xff] %vm441_vm0, %v1134_v8  ;;  %v1092_v31 = vadd.f32 %v1420_v21, %v1035_v0  ;;  %v1038_v3 = vadd.f32 %v1395_v1, %v1367_v18 }
 0x21f   : > { %v1124_v4 = vadd.f32 %v1120_v9, %v1092_v31  ;;  %v1093_v5 = vadd.f32 %v1423_v24, %v1038_v3 }
 0x221   : > { %v1135_v6 = vmul.f32 %v1331_v53, %v1124_v4  ;;  %v1125_v35 = vadd.f32 %v1121_v32, %v1093_v5 }
 0x223   : > { %1139 = vst.msk [vmem:[%s378_s25 + $0x10] sm:$0xff] %vm441_vm0, %v1135_v6  ;;  %v1136_v12 = vmul.f32 %v1331_v53, %v1125_v35 }
 0x225   : > { %1140 = vst.msk [vmem:[%s378_s25 + $0x18] sm:$0xff] %vm441_vm0, %v1136_v12 }
 0x226   : > { %1551 = shalt.err (!%p1548_p5)
}
 0x227   : > { %s1552_s23 = scalar_lea.hbm %s1982_s20, 512  ;;  %s1556_s21 = scalar_lea.hbm %s2044_s8, 1024 }
 0x228   : > { %p1553_p6 = scmp.ne.s32.totalorder %s1982_s20, %s1552_s23  ;;  %p1557_p10 = scmp.lt.u32.totalorder %s1982_s20, %s2044_s8 }
 0x229   : > { %p1558_p11 = scmp.lt.u32.totalorder %s1556_s21, %s1552_s23  ;;  %p1560_p13 = scmp.lt.u32.totalorder %s1552_s23, %s1982_s20 }
 0x22a   : > { %p1554_p7 = pnand %p1553_p6, %p1707_p4 }
 0x22b   : > { %p1559_p12 = por %p1558_p11, %p1557_p10 }
 0x22c   : > { %p1555_p9 = pneg %p1554_p7 }
 0x22d   : > { %p1561_p0 = por %p1560_p13, %p1559_p12 }
 0x22f   : > { %p1562_p1 = pnand %p1561_p0, %p1555_p9 }
 0x231   : > { %1565 = shalt.err (!%p1562_p1)
}
 0x232   : > { %s1620_s22 = smov 128   ;;  %s1621_s12 = smov 8  }
 0x233   : > { %1440 = dma.vmem_to_hbm [thread:$0]  (%p1707_p4), %s1984_s14, 512, %s1982_s20, %s1990_s30, %s1620_s22, %s1620_s22, %s1621_s12  }
 0x234 PF: > { %p1446_p2 = scmp.ge.s32.totalorder %s1616_s10, 2  ;;  %s1172_s24 = sand.u32 1, %s1596_s27  }
 0x235   : > { %s1173_s26 = scalar_lea.sflag [#allocation3], %s1172_s24 }
 0x236   : > { %p1443_p3 = pnand %p1446_p2, %p1714_p8 }
 0x238   : > { %1591 = dma.done.wait (!%p1443_p3), %s1173_s26, 512  }
 0x239   : > { %1593 = vsyncadd (!%p1443_p3), %s1173_s26, 4294966784  ;;  %s21_s10 = sadd.s32 1, %s1616_s10   ;;  %s2047_s27 = smov %s1600_s28 }
 0x23a   : > { %p18_p5 = scmp.ge.s32.totalorder %s21_s10, 4   ;;  %s2048_s28 = smov %s1604_s29 }
 0x23b   : > { %s2049_s29 = smov %s1720_s18  ;;  %s2050_s30 = smov %s1612_s9 }
 0x23c   : > { %s2051_s9 = smov %s2053_s13  ;;  %20 = sbr.rel (!%p18_p5) target bundleno = 4 (0x4), region = 96 }
 0x243   :  { %1178 = vsyncpa [#allocation3], 1 }
 0x244   :  { %1180 = vsyncpa [#allocation3 + $0x1], 1 }

</bundles_post_ra>
